<compile_context>
chip_gen: v7x
topology: tpu7x:2x2x1
jax: 0.10.0
libtpu: 0.0.40
codegen_flags: <defaults>
</compile_context>

<pallas_src>
import functools

import jax
import jax.numpy as jnp
import numpy as np
from jax import lax
from jax.experimental import pallas as pl
from jax.experimental.pallas import tpu as pltpu

# (name, stride, padding, activation) -- fixed structure of the synthetic
# downsample-by-4 backbone + head used in place of the (not provided)
# ResnetBackbone / CenterNetHead.
_LAYERS = (
    ("bb_conv1", 2, 1, "relu"),
    ("bb_conv2", 2, 1, "relu"),
    ("head_conv1", 1, 1, "relu"),
    ("head_conv2", 1, 0, None),
)


def _round_up(x, m):
    return (x + m - 1) // m * m


# ------------------------------ fused kernel --------------------------------

def _centernet_kernel(lhs1_ref, w1_ref, w2_ref, b2_ref, w3_ref, b3_ref,
                      w4_ref, b4_ref, pts_ref, pk_ref,
                      pad3_ref, col3_ref, nms_ref, *, ho, wo, nms_k):
    """Fused backbone + head + PointsNonMaxSuppression for ONE image.

    lhs1_ref : (1, ho*wo, K1)      bf16  tap-packed layer-1 operand (wrapper)
    w1_ref   : (K1, 9*c1)          bf16  bb_conv1 weights+bias, block-diagonal
                                         over the 9 bb_conv2 taps
    w2_ref   : (9*c1, c2)          bf16  bb_conv2 weights, taps packed along K
    w3_ref   : (9*c2, c3)          bf16  head_conv1 weights, taps packed on K
    w4_ref   : (c3, c_out)         bf16  head_conv2 (1x1) weights
    b*_ref   : (1, c*)             f32   biases (added on the f32 accumulator)
    pts_ref  : (1, ho*wo, c_out)   f32   head output ("points")
    pk_ref   : (1, ho*wo, c_out)   f32   NMS'd points ("peaks")
    pad3_ref : VMEM (ho+2, wpad, c2)       bf16  padded head_conv1 input
    col3_ref : VMEM (ho*wo, 9*c2)          bf16  head_conv1 im2col slab
    nms_ref  : VMEM (ho+2p, wpad_n, c_out) f32   -inf-bordered NMS tile
    """
    f32, bf16 = jnp.float32, jnp.bfloat16
    m = ho * wo
    c2 = pad3_ref.shape[-1]
    c_out = pts_ref.shape[-1]

    # bb_conv1 (+bias, ReLU).  The block-diagonal weight layout makes this one
    # matmul emit bb_conv2's tap-packed im2col LHS directly, so the stride-2
    # layer needs no in-kernel gather at all.
    h1t = jnp.dot(lhs1_ref[0], w1_ref[...], preferred_element_type=f32)
    h1t = jnp.maximum(h1t, 0.0).astype(bf16)                     # (m, 9*c1)

    # bb_conv2: a single dense-K matmul (K = 9*c1), f32 acc + bias + ReLU.
    h2 = jnp.dot(h1t, w2_ref[...], preferred_element_type=f32) + b2_ref[...]
    h2 = jnp.maximum(h2, 0.0).astype(bf16)                        # (m, c2)

    # head_conv1: explicit im2col slab in VMEM scratch (only the border strips
    # of the padded tile are zeroed), then ONE K = 9*c2 matmul.
    wpad = pad3_ref.shape[1]
    pad3_ref[0:1, :, :] = jnp.zeros((1, wpad, c2), bf16)
    pad3_ref[ho + 1:ho + 2, :, :] = jnp.zeros((1, wpad, c2), bf16)
    pad3_ref[:, 0:1, :] = jnp.zeros((ho + 2, 1, c2), bf16)
    pad3_ref[:, wo + 1:wo + 2, :] = jnp.zeros((ho + 2, 1, c2), bf16)
    pad3_ref[1:ho + 1, 1:wo + 1, :] = h2.reshape(ho, wo, c2)
    for t, (dh, dw) in enumerate((i, j) for i in range(3) for j in range(3)):
        col3_ref[:, t * c2:(t + 1) * c2] = (
            pad3_ref[dh:dh + ho, dw:dw + wo, :].reshape(m, c2))
    h3 = jnp.dot(col3_ref[...], w3_ref[...], preferred_element_type=f32)
    h3 = jnp.maximum(h3 + b3_ref[...], 0.0).astype(bf16)          # (m, c3)

    # head_conv2 (1x1): points.  Only the real (lane-padded to 8) channels.
    h4 = jnp.dot(h3, w4_ref[...], preferred_element_type=f32) + b4_ref[...]
    pts_ref[0] = h4                                               # (m, c_out)

    # PointsNonMaxSuppression epilogue: 3x3 stride-1 max-pool with implicit
    # -inf padding, keep-mask by exact equality (matches torch semantics),
    # computed on the VMEM-resident points -- no extra HBM round trip.
    pad = (nms_k - 1) // 2
    p = h4.reshape(ho, wo, c_out)
    if pad > 0:
        wpad_n = nms_ref.shape[1]
        neg_row = jnp.full((pad, wpad_n, c_out), -jnp.inf, f32)
        neg_col = jnp.full((ho + 2 * pad, pad, c_out), -jnp.inf, f32)
        nms_ref[0:pad, :, :] = neg_row
        nms_ref[ho + pad:ho + 2 * pad, :, :] = neg_row
        nms_ref[:, 0:pad, :] = neg_col
        nms_ref[:, wo + pad:wo + 2 * pad, :] = neg_col
    nms_ref[pad:ho + pad, pad:wo + pad, :] = p
    pooled = p
    for dh in range(nms_k):
        for dw in range(nms_k):
            if dh == pad and dw == pad:
                continue
            pooled = jnp.maximum(pooled, nms_ref[dh:dh + ho, dw:dw + wo, :])
    pk_ref[0] = (p * (pooled == p).astype(f32)).reshape(m, c_out)


# --------------------------------- params -----------------------------------

def init_params(key, num_classes=2):
    ks = jax.random.split(key, 4)

    def w_init(k, shape):
        return 0.1 * jax.random.normal(k, shape, jnp.float32)

    return {
        "bb_conv1_w": w_init(ks[0], (16, 3, 3, 3)),
        "bb_conv1_b": jnp.zeros((16,), jnp.float32),
        "bb_conv2_w": w_init(ks[1], (64, 16, 3, 3)),
        "bb_conv2_b": jnp.zeros((64,), jnp.float32),
        "head_conv1_w": w_init(ks[2], (64, 64, 3, 3)),
        "head_conv1_b": jnp.zeros((64,), jnp.float32),
        "head_conv2_w": w_init(ks[3], (num_classes + 4, 64, 1, 1)),
        "head_conv2_b": jnp.zeros((num_classes + 4,), jnp.float32),
    }


def _pack_khwc(w):
    """(C_out, C_in, kh, kw) -> (kh*kw*C_in, C_out); tap-major, channel-minor."""
    co, ci, kh, kw = w.shape
    return jnp.transpose(w, (2, 3, 1, 0)).reshape(kh * kw * ci, co)


def pack_params(params):
    """One-time weight packing for the fused kernel (bf16 MXU operands).

    bb_conv1's (27, c1) weight plus its bias row is replicated block-diagonally
    across the 9 bb_conv2 taps, so the layer-1 matmul directly produces
    bb_conv2's tap-packed im2col LHS (the ~2 MFLOP of structural zeros this
    adds are negligible next to the relayouts / extra passes it removes).
    bb_conv2 / head_conv1 weights are tap-packed along K; head_conv2 output
    channels are padded to 8 lanes (6 real)."""
    w1, b1 = params["bb_conv1_w"], params["bb_conv1_b"]
    w2, b2 = params["bb_conv2_w"], params["bb_conv2_b"]
    w3, b3 = params["head_conv1_w"], params["head_conv1_b"]
    w4, b4 = params["head_conv2_w"], params["head_conv2_b"]
    c1, cin, kh, kw = w1.shape
    assert (kh, kw) == (3, 3) and w2.shape[2:] == (3, 3) and w3.shape[2:] == (3, 3)
    taps = kh * kw
    c2, c3, c_out = w2.shape[0], w3.shape[0], w4.shape[0]
    c_out_p = _round_up(c_out, 8)

    blk = jnp.concatenate([_pack_khwc(w1), b1[None, :]], axis=0)   # (28, c1)
    kblk = blk.shape[0]
    k1 = _round_up(taps * kblk, 128)                               # 252 -> 256
    w1_blk = jnp.zeros((k1, taps * c1), jnp.float32)
    for t in range(taps):
        w1_blk = w1_blk.at[t * kblk:(t + 1) * kblk,
                           t * c1:(t + 1) * c1].set(blk)

    w4p = jnp.pad(_pack_khwc(w4), ((0, 0), (0, c_out_p - c_out)))
    b4p = jnp.pad(b4, (0, c_out_p - c_out))

    return {
        "w1": w1_blk.astype(jnp.bfloat16),                  # (k1, 9*c1)
        "w2": _pack_khwc(w2).astype(jnp.bfloat16),          # (9*c1, c2)
        "b2": b2.reshape(1, c2).astype(jnp.float32),
        "w3": _pack_khwc(w3).astype(jnp.bfloat16),          # (9*c2, c3)
        "b3": b3.reshape(1, c3).astype(jnp.float32),
        "w4": w4p.astype(jnp.bfloat16),                     # (c3, c_out_p)
        "b4": b4p.reshape(1, c_out_p).astype(jnp.float32),
        "dims": dict(cin=cin, c1=c1, c2=c2, c3=c3, c_out=c_out,
                     c_out_p=c_out_p, kh=kh, kw=kw, kblk=kblk, k1=k1),
    }


# ------------------------------ kernel wrapper -------------------------------

def _build_lhs1(x_nhwc, dims):
    """Tap-packed layer-1 operand for the fused kernel (one-time, tiny, XLA).

    For each bb_conv2 output pixel and each of its 9 taps, the matching
    bb_conv1 3x3xC_in input patch plus a constant-1 column (folds bb_conv1's
    bias and makes bb_conv2's zero padding exact after the ReLU) is laid out
    along lanes; taps falling into bb_conv2's spatial padding are all-zero
    blocks.  This replaces both the old 128-channel zero padding of the raw
    input in HBM (~42x read blowup) and the per-layer phase-decompose copies."""
    b, h, w, _ = x_nhwc.shape
    kh, kw, kblk, k1 = dims["kh"], dims["kw"], dims["kblk"], dims["k1"]
    taps = kh * kw
    h1, w1 = h // 2, w // 2          # bb_conv1 output size (stride 2, pad 1)
    h2, w2 = h1 // 2, w1 // 2        # bb_conv2 output size (stride 2, pad 1)

    xp = jnp.pad(x_nhwc, ((0, 0), (1, 1), (1, 1), (0, 0)))
    patches = jnp.concatenate(
        [xp[:, ki:ki + 2 * h1:2, kj:kj + 2 * w1:2, :]
         for ki in range(kh) for kj in range(kw)], axis=-1)        # (b,h1,w1,27)
    patches = jnp.concatenate(
        [patches, jnp.ones(patches.shape[:-1] + (1,), patches.dtype)],
        axis=-1)                                                    # bias column
    pp = jnp.pad(patches, ((0, 0), (1, 1), (1, 1), (0, 0)))
    lhs = jnp.concatenate(
        [pp[:, ki:ki + 2 * h2:2, kj:kj + 2 * w2:2, :]
         for ki in range(kh) for kj in range(kw)], axis=-1)         # (b,h2,w2,252)
    lhs = lhs.reshape(b, h2 * w2, taps * kblk)
    lhs = jnp.pad(lhs, ((0, 0), (0, 0), (0, k1 - taps * kblk)))     # lane-pad 256
    return lhs.astype(jnp.bfloat16)


def centernet_points_and_peaks(packed, x_nchw, nms_kernel_size=3):
    """Runs the fused backbone + head + NMS Pallas kernel.

    x_nchw : (B, C_in, H, W) f32 with H, W divisible by 4.
    Returns (points, peaks), both (B, c_out, H/4, W/4) f32 in NCHW."""
    d = packed["dims"]
    b, cin, h, w = x_nchw.shape
    assert cin == d["cin"] and h % 4 == 0 and w % 4 == 0
    ho, wo = h // 4, w // 4
    m = ho * wo
    taps = d["kh"] * d["kw"]
    k1, c1, c2, c3 = d["k1"], d["c1"], d["c2"], d["c3"]
    c_out, c_out_p = d["c_out"], d["c_out_p"]
    n1t, k3 = taps * c1, taps * c2
    npad = (nms_kernel_size - 1) // 2

    lhs1 = _build_lhs1(jnp.transpose(x_nchw, (0, 2, 3, 1)), d)

    kernel = functools.partial(_centernet_kernel, ho=ho, wo=wo,
                               nms_k=nms_kernel_size)
    flops = 2 * b * m * (k1 * n1t + n1t * c2 + k3 * c3 + c3 * c_out_p)
    bytes_accessed = (lhs1.size * 2
                      + 2 * (k1 * n1t + n1t * c2 + k3 * c3 + c3 * c_out_p)
                      + 2 * b * m * c_out_p * 4)

    pts, pks = pl.pallas_call(
        kernel,
        out_shape=(jax.ShapeDtypeStruct((b, m, c_out_p), jnp.float32),
                   jax.ShapeDtypeStruct((b, m, c_out_p), jnp.float32)),
        grid=(b,),
        in_specs=[
            pl.BlockSpec((1, m, k1), lambda i: (i, 0, 0)),
            # Grid-independent index maps: weights/biases stay VMEM-resident.
            pl.BlockSpec((k1, n1t), lambda i: (0, 0)),
            pl.BlockSpec((n1t, c2), lambda i: (0, 0)),
            pl.BlockSpec((1, c2), lambda i: (0, 0)),
            pl.BlockSpec((k3, c3), lambda i: (0, 0)),
            pl.BlockSpec((1, c3), lambda i: (0, 0)),
            pl.BlockSpec((c3, c_out_p), lambda i: (0, 0)),
            pl.BlockSpec((1, c_out_p), lambda i: (0, 0)),
        ],
        out_specs=[pl.BlockSpec((1, m, c_out_p), lambda i: (i, 0, 0)),
                   pl.BlockSpec((1, m, c_out_p), lambda i: (i, 0, 0))],
        scratch_shapes=[
            pltpu.VMEM((ho + 2, _round_up(wo + 2, 8), c2), jnp.bfloat16),
            pltpu.VMEM((m, k3), jnp.bfloat16),
            pltpu.VMEM((ho + 2 * npad, _round_up(wo + 2 * npad, 8), c_out_p),
                       jnp.float32),
        ],
        compiler_params=pltpu.CompilerParams(
            dimension_semantics=("parallel",)),
        cost_estimate=pl.CostEstimate(flops=flops, transcendentals=0,
                                      bytes_accessed=bytes_accessed),
    )(lhs1, packed["w1"], packed["w2"], packed["b2"], packed["w3"],
      packed["b3"], packed["w4"], packed["b4"])

    def to_nchw(t):
        return jnp.transpose(t[..., :c_out].reshape(b, ho, wo, c_out),
                             (0, 3, 1, 2))

    return to_nchw(pts), to_nchw(pks)


# -------------------------------- CenterNet ----------------------------------

def centernet_forward(packed, x, return_objects=False, nms_kernel_size=3):
    """CenterNet forward.  x is NCHW; output is NCHW.

    TODO(synk): ResnetBackbone / CenterNetHead were not provided; a small
    synthetic downsample-by-4 conv backbone + conv head is used instead.
    TODO(synk): PointsToObjects is not defined in the provided source, so the
    return_objects path returns the NMS'd points (peaks); ScaleObjects is
    implemented as scale_objects() and exercised separately in __main__."""
    pts, pks = centernet_points_and_peaks(packed, x, nms_kernel_size)
    return pks if return_objects else pts


def scale_objects(objects, scale=4):
    """ScaleObjects (functional): objects[..., :4] *= scale.  A ~100-element
    elementwise op -- a dedicated Pallas launch would cost more than the work,
    so it stays a plain (XLA-fused) JAX op per the perf review."""
    dd = objects.shape[-1]
    factor = jnp.where(jnp.arange(dd) < 4,
                       jnp.asarray(scale, objects.dtype),
                       jnp.asarray(1, objects.dtype))
    return objects * factor


# -------------------------------- references ---------------------------------

def _ref_conv(x, w, b, stride, padding, activation):
    # Mirrors the kernel's numerics: bf16 MXU operands, f32 accumulation.
    out = lax.conv_general_dilated(
        x.astype(jnp.bfloat16), w.astype(jnp.bfloat16),
        (stride, stride), ((padding, padding), (padding, padding)),
        dimension_numbers=("NCHW", "OIHW", "NCHW"),
        preferred_element_type=jnp.float32)
    out = out + b[None, :, None, None]
    if activation == "relu":
        out = jnp.maximum(out, 0.0)
    return out


def _ref_forward(params, x):
    h = x
    for name, stride, padding, act in _LAYERS:
        h = _ref_conv(h, params[name + "_w"], params[name + "_b"],
                      stride, padding, act)
    return h


if __name__ == "__main__":
    key = jax.random.PRNGKey(0)
    kx, kp, ko = jax.random.split(key, 3)

    x = jax.random.normal(kx, (2, 3, 32, 32), jnp.float32)
    params = init_params(kp, num_classes=2)
    packed = pack_params(params)

    # Single fused kernel launch: backbone + head + NMS -> (2, 6, 8, 8) NCHW.
    points, peaks = centernet_points_and_peaks(packed, x)
    points = jax.block_until_ready(points)
    peaks = jax.block_until_ready(peaks)

    # Module-level entry points (reuse the same compiled kernel).
    fwd = jax.block_until_ready(centernet_forward(packed, x))
    fwd_nms = jax.block_until_ready(
        centernet_forward(packed, x, return_objects=True))
    assert fwd.shape == (2, 6, 8, 8) and fwd_nms.shape == (2, 6, 8, 8)

    # ScaleObjects on a synthetic (b, n, 6) objects tensor.
    objects = jax.random.normal(ko, (2, 8, 6), jnp.float32)
    scaled = jax.block_until_ready(scale_objects(objects, scale=4))

    # --- correctness checks --------------------------------------------------
    # Conv stack vs. a lax.conv reference with matching bf16-in / f32-acc math.
    ref_points = _ref_forward(params, x)
    np.testing.assert_allclose(np.array(points), np.array(ref_points),
                               rtol=2e-2, atol=2e-2)

    # Fused NMS epilogue vs. reduce_window applied to the same points output.
    ref_pool = lax.reduce_window(points, -jnp.inf, lax.max,
                                 (1, 1, 3, 3), (1, 1, 1, 1), "SAME")
    ref_peaks = points * (ref_pool == points).astype(points.dtype)
    np.testing.assert_allclose(np.array(peaks), np.array(ref_peaks),
                               rtol=0.0, atol=1e-6)

    # ScaleObjects semantics: objects[:, :, :4] *= 4.
    ref_scaled = objects.at[:, :, :4].multiply(4.0)
    np.testing.assert_allclose(np.array(scaled), np.array(ref_scaled),
                               rtol=1e-6, atol=1e-6)

    print("KERNEL_OK")
</pallas_src>

<mosaic_0001>
module attributes {stable_mosaic.version = 11 : i64} {
  func.func @_centernet_kernel(%arg0: i32, %arg1: memref<1x64x256xbf16, #tpu.memory_space<vmem>>, %arg2: memref<256x144xbf16, #tpu.memory_space<vmem>>, %arg3: memref<144x64xbf16, #tpu.memory_space<vmem>>, %arg4: memref<1x64xf32, #tpu.memory_space<vmem>>, %arg5: memref<576x64xbf16, #tpu.memory_space<vmem>>, %arg6: memref<1x64xf32, #tpu.memory_space<vmem>>, %arg7: memref<64x8xbf16, #tpu.memory_space<vmem>>, %arg8: memref<1x8xf32, #tpu.memory_space<vmem>>, %arg9: memref<1x64x8xf32, #tpu.memory_space<vmem>>, %arg10: memref<1x64x8xf32, #tpu.memory_space<vmem>>, %arg11: memref<10x16x64xbf16, #tpu.memory_space<vmem>>, %arg12: memref<64x576xbf16, #tpu.memory_space<vmem>>, %arg13: memref<10x16x8xf32, #tpu.memory_space<vmem>>) attributes {dimension_semantics = [#tpu.dimension_semantics<parallel>], iteration_bounds = array<i64: 2>, scalar_prefetch = 0 : i64, scratch_operands = 3 : i64, tpu.core_type = #tpu.core_type<tc>, window_params = [{transform_indices = @transform_0, window_bounds = array<i64: 1, 64, 256>}, {pipeline_mode = #tpu.pipeline_mode<synchronous>, transform_indices = @transform_1, window_bounds = array<i64: 256, 144>}, {pipeline_mode = #tpu.pipeline_mode<synchronous>, transform_indices = @transform_2, window_bounds = array<i64: 144, 64>}, {pipeline_mode = #tpu.pipeline_mode<synchronous>, transform_indices = @transform_3, window_bounds = array<i64: 1, 64>}, {pipeline_mode = #tpu.pipeline_mode<synchronous>, transform_indices = @transform_4, window_bounds = array<i64: 576, 64>}, {pipeline_mode = #tpu.pipeline_mode<synchronous>, transform_indices = @transform_5, window_bounds = array<i64: 1, 64>}, {pipeline_mode = #tpu.pipeline_mode<synchronous>, transform_indices = @transform_6, window_bounds = array<i64: 64, 8>}, {pipeline_mode = #tpu.pipeline_mode<synchronous>, transform_indices = @transform_7, window_bounds = array<i64: 1, 8>}, {transform_indices = @transform_8, window_bounds = array<i64: 1, 64, 8>}, {transform_indices = @transform_9, window_bounds = array<i64: 1, 64, 8>}]} {
    %c0 = arith.constant 0 : index
    %c0_0 = arith.constant 0 : index
    %c0_1 = arith.constant 0 : index
    %0 = vector.load %arg1[%c0, %c0_0, %c0_1] : memref<1x64x256xbf16, #tpu.memory_space<vmem>>, vector<1x64x256xbf16>
    %1 = vector.shape_cast %0 : vector<1x64x256xbf16> to vector<64x256xbf16>
    %c0_2 = arith.constant 0 : index
    %c0_3 = arith.constant 0 : index
    %2 = vector.load %arg2[%c0_2, %c0_3] : memref<256x144xbf16, #tpu.memory_space<vmem>>, vector<256x144xbf16>
    %cst = arith.constant dense<0.000000e+00> : vector<64x144xf32>
    %3 = tpu.matmul %1, %2, %cst {dimension_numbers = #tpu.dot_dimension_numbers<[1], [0], [0], [1], [0, 0, 1, 1], [], []>} : vector<64x256xbf16>, vector<256x144xbf16>, vector<64x144xf32> -> vector<64x144xf32>
    %cst_4 = arith.constant 0.000000e+00 : f32
    %4 = vector.broadcast %cst_4 : f32 to vector<64x144xf32>
    %5 = arith.maximumf %3, %4 : vector<64x144xf32>
    %6 = arith.truncf %5 : vector<64x144xf32> to vector<64x144xbf16>
    %c0_5 = arith.constant 0 : index
    %c0_6 = arith.constant 0 : index
    %7 = vector.load %arg3[%c0_5, %c0_6] : memref<144x64xbf16, #tpu.memory_space<vmem>>, vector<144x64xbf16>
    %cst_7 = arith.constant dense<0.000000e+00> : vector<64x64xf32>
    %8 = tpu.matmul %6, %7, %cst_7 {dimension_numbers = #tpu.dot_dimension_numbers<[1], [0], [0], [1], [0, 0, 1, 1], [], []>} : vector<64x144xbf16>, vector<144x64xbf16>, vector<64x64xf32> -> vector<64x64xf32>
    %c0_8 = arith.constant 0 : index
    %c0_9 = arith.constant 0 : index
    %9 = vector.load %arg4[%c0_8, %c0_9] : memref<1x64xf32, #tpu.memory_space<vmem>>, vector<1x64xf32>
    %10 = vector.broadcast %9 : vector<1x64xf32> to vector<64x64xf32>
    %11 = arith.addf %8, %10 : vector<64x64xf32>
    %cst_10 = arith.constant 0.000000e+00 : f32
    %12 = vector.broadcast %cst_10 : f32 to vector<64x64xf32>
    %13 = arith.maximumf %11, %12 : vector<64x64xf32>
    %14 = arith.truncf %13 : vector<64x64xf32> to vector<64x64xbf16>
    %cst_11 = arith.constant 0.000000e+00 : bf16
    %15 = vector.broadcast %cst_11 : bf16 to vector<1x16x64xbf16>
    %c0_12 = arith.constant 0 : index
    %c0_13 = arith.constant 0 : index
    %c0_14 = arith.constant 0 : index
    %16 = vector.load %arg11[%c0_12, %c0_13, %c0_14] : memref<10x16x64xbf16, #tpu.memory_space<vmem>>, vector<1x16x64xbf16>
    tpu.vector_store %arg11[%c0_12, %c0_13, %c0_14], %15 {strides = array<i32>} : memref<10x16x64xbf16, #tpu.memory_space<vmem>>, vector<1x16x64xbf16>,
    %cst_15 = arith.constant 0.000000e+00 : bf16
    %17 = vector.broadcast %cst_15 : bf16 to vector<1x16x64xbf16>
    %c9 = arith.constant 9 : index
    %c0_16 = arith.constant 0 : index
    %c0_17 = arith.constant 0 : index
    %18 = vector.load %arg11[%c9, %c0_16, %c0_17] : memref<10x16x64xbf16, #tpu.memory_space<vmem>>, vector<1x16x64xbf16>
    tpu.vector_store %arg11[%c9, %c0_16, %c0_17], %17 {strides = array<i32>} : memref<10x16x64xbf16, #tpu.memory_space<vmem>>, vector<1x16x64xbf16>,
    %cst_18 = arith.constant 0.000000e+00 : bf16
    %19 = vector.broadcast %cst_18 : bf16 to vector<10x1x64xbf16>
    %c0_19 = arith.constant 0 : index
    %c0_20 = arith.constant 0 : index
    %c0_21 = arith.constant 0 : index
    %20 = vector.load %arg11[%c0_19, %c0_20, %c0_21] : memref<10x16x64xbf16, #tpu.memory_space<vmem>>, vector<10x1x64xbf16>
    tpu.vector_store %arg11[%c0_19, %c0_20, %c0_21], %19 {strides = array<i32>} : memref<10x16x64xbf16, #tpu.memory_space<vmem>>, vector<10x1x64xbf16>,
    %cst_22 = arith.constant 0.000000e+00 : bf16
    %21 = vector.broadcast %cst_22 : bf16 to vector<10x1x64xbf16>
    %c0_23 = arith.constant 0 : index
    %c9_24 = arith.constant 9 : index
    %c0_25 = arith.constant 0 : index
    %22 = vector.load %arg11[%c0_23, %c9_24, %c0_25] : memref<10x16x64xbf16, #tpu.memory_space<vmem>>, vector<10x1x64xbf16>
    tpu.vector_store %arg11[%c0_23, %c9_24, %c0_25], %21 {strides = array<i32>} : memref<10x16x64xbf16, #tpu.memory_space<vmem>>, vector<10x1x64xbf16>,
    %23 = vector.shape_cast %14 : vector<64x64xbf16> to vector<8x8x64xbf16>
    %c1 = arith.constant 1 : index
    %c1_26 = arith.constant 1 : index
    %c0_27 = arith.constant 0 : index
    %24 = vector.load %arg11[%c1, %c1_26, %c0_27] : memref<10x16x64xbf16, #tpu.memory_space<vmem>>, vector<8x8x64xbf16>
    tpu.vector_store %arg11[%c1, %c1_26, %c0_27], %23 {strides = array<i32>} : memref<10x16x64xbf16, #tpu.memory_space<vmem>>, vector<8x8x64xbf16>,
    %c0_28 = arith.constant 0 : index
    %c0_29 = arith.constant 0 : index
    %c0_30 = arith.constant 0 : index
    %25 = vector.load %arg11[%c0_28, %c0_29, %c0_30] : memref<10x16x64xbf16, #tpu.memory_space<vmem>>, vector<8x8x64xbf16>
    %26 = vector.shape_cast %25 : vector<8x8x64xbf16> to vector<64x64xbf16>
    %c0_31 = arith.constant 0 : index
    %c0_32 = arith.constant 0 : index
    %27 = vector.load %arg12[%c0_31, %c0_32] : memref<64x576xbf16, #tpu.memory_space<vmem>>, vector<64x64xbf16>
    tpu.vector_store %arg12[%c0_31, %c0_32], %26 {strides = array<i32>} : memref<64x576xbf16, #tpu.memory_space<vmem>>, vector<64x64xbf16>,
    %c0_33 = arith.constant 0 : index
    %c1_34 = arith.constant 1 : index
    %c0_35 = arith.constant 0 : index
    %28 = vector.load %arg11[%c0_33, %c1_34, %c0_35] : memref<10x16x64xbf16, #tpu.memory_space<vmem>>, vector<8x8x64xbf16>
    %29 = vector.shape_cast %28 : vector<8x8x64xbf16> to vector<64x64xbf16>
    %c0_36 = arith.constant 0 : index
    %c64 = arith.constant 64 : index
    %30 = vector.load %arg12[%c0_36, %c64] : memref<64x576xbf16, #tpu.memory_space<vmem>>, vector<64x64xbf16>
    tpu.vector_store %arg12[%c0_36, %c64], %29 {strides = array<i32>} : memref<64x576xbf16, #tpu.memory_space<vmem>>, vector<64x64xbf16>,
    %c0_37 = arith.constant 0 : index
    %c2 = arith.constant 2 : index
    %c0_38 = arith.constant 0 : index
    %31 = vector.load %arg11[%c0_37, %c2, %c0_38] : memref<10x16x64xbf16, #tpu.memory_space<vmem>>, vector<8x8x64xbf16>
    %32 = vector.shape_cast %31 : vector<8x8x64xbf16> to vector<64x64xbf16>
    %c0_39 = arith.constant 0 : index
    %c128 = arith.constant 128 : index
    %33 = vector.load %arg12[%c0_39, %c128] : memref<64x576xbf16, #tpu.memory_space<vmem>>, vector<64x64xbf16>
    tpu.vector_store %arg12[%c0_39, %c128], %32 {strides = array<i32>} : memref<64x576xbf16, #tpu.memory_space<vmem>>, vector<64x64xbf16>,
    %c1_40 = arith.constant 1 : index
    %c0_41 = arith.constant 0 : index
    %c0_42 = arith.constant 0 : index
    %34 = vector.load %arg11[%c1_40, %c0_41, %c0_42] : memref<10x16x64xbf16, #tpu.memory_space<vmem>>, vector<8x8x64xbf16>
    %35 = vector.shape_cast %34 : vector<8x8x64xbf16> to vector<64x64xbf16>
    %c0_43 = arith.constant 0 : index
    %c192 = arith.constant 192 : index
    %36 = vector.load %arg12[%c0_43, %c192] : memref<64x576xbf16, #tpu.memory_space<vmem>>, vector<64x64xbf16>
    tpu.vector_store %arg12[%c0_43, %c192], %35 {strides = array<i32>} : memref<64x576xbf16, #tpu.memory_space<vmem>>, vector<64x64xbf16>,
    %c1_44 = arith.constant 1 : index
    %c1_45 = arith.constant 1 : index
    %c0_46 = arith.constant 0 : index
    %37 = vector.load %arg11[%c1_44, %c1_45, %c0_46] : memref<10x16x64xbf16, #tpu.memory_space<vmem>>, vector<8x8x64xbf16>
    %38 = vector.shape_cast %37 : vector<8x8x64xbf16> to vector<64x64xbf16>
    %c0_47 = arith.constant 0 : index
    %c256 = arith.constant 256 : index
    %39 = vector.load %arg12[%c0_47, %c256] : memref<64x576xbf16, #tpu.memory_space<vmem>>, vector<64x64xbf16>
    tpu.vector_store %arg12[%c0_47, %c256], %38 {strides = array<i32>} : memref<64x576xbf16, #tpu.memory_space<vmem>>, vector<64x64xbf16>,
    %c1_48 = arith.constant 1 : index
    %c2_49 = arith.constant 2 : index
    %c0_50 = arith.constant 0 : index
    %40 = vector.load %arg11[%c1_48, %c2_49, %c0_50] : memref<10x16x64xbf16, #tpu.memory_space<vmem>>, vector<8x8x64xbf16>
    %41 = vector.shape_cast %40 : vector<8x8x64xbf16> to vector<64x64xbf16>
    %c0_51 = arith.constant 0 : index
    %c320 = arith.constant 320 : index
    %42 = vector.load %arg12[%c0_51, %c320] : memref<64x576xbf16, #tpu.memory_space<vmem>>, vector<64x64xbf16>
    tpu.vector_store %arg12[%c0_51, %c320], %41 {strides = array<i32>} : memref<64x576xbf16, #tpu.memory_space<vmem>>, vector<64x64xbf16>,
    %c2_52 = arith.constant 2 : index
    %c0_53 = arith.constant 0 : index
    %c0_54 = arith.constant 0 : index
    %43 = vector.load %arg11[%c2_52, %c0_53, %c0_54] : memref<10x16x64xbf16, #tpu.memory_space<vmem>>, vector<8x8x64xbf16>
    %44 = vector.shape_cast %43 : vector<8x8x64xbf16> to vector<64x64xbf16>
    %c0_55 = arith.constant 0 : index
    %c384 = arith.constant 384 : index
    %45 = vector.load %arg12[%c0_55, %c384] : memref<64x576xbf16, #tpu.memory_space<vmem>>, vector<64x64xbf16>
    tpu.vector_store %arg12[%c0_55, %c384], %44 {strides = array<i32>} : memref<64x576xbf16, #tpu.memory_space<vmem>>, vector<64x64xbf16>,
    %c2_56 = arith.constant 2 : index
    %c1_57 = arith.constant 1 : index
    %c0_58 = arith.constant 0 : index
    %46 = vector.load %arg11[%c2_56, %c1_57, %c0_58] : memref<10x16x64xbf16, #tpu.memory_space<vmem>>, vector<8x8x64xbf16>
    %47 = vector.shape_cast %46 : vector<8x8x64xbf16> to vector<64x64xbf16>
    %c0_59 = arith.constant 0 : index
    %c448 = arith.constant 448 : index
    %48 = vector.load %arg12[%c0_59, %c448] : memref<64x576xbf16, #tpu.memory_space<vmem>>, vector<64x64xbf16>
    tpu.vector_store %arg12[%c0_59, %c448], %47 {strides = array<i32>} : memref<64x576xbf16, #tpu.memory_space<vmem>>, vector<64x64xbf16>,
    %c2_60 = arith.constant 2 : index
    %c2_61 = arith.constant 2 : index
    %c0_62 = arith.constant 0 : index
    %49 = vector.load %arg11[%c2_60, %c2_61, %c0_62] : memref<10x16x64xbf16, #tpu.memory_space<vmem>>, vector<8x8x64xbf16>
    %50 = vector.shape_cast %49 : vector<8x8x64xbf16> to vector<64x64xbf16>
    %c0_63 = arith.constant 0 : index
    %c512 = arith.constant 512 : index
    %51 = vector.load %arg12[%c0_63, %c512] : memref<64x576xbf16, #tpu.memory_space<vmem>>, vector<64x64xbf16>
    tpu.vector_store %arg12[%c0_63, %c512], %50 {strides = array<i32>} : memref<64x576xbf16, #tpu.memory_space<vmem>>, vector<64x64xbf16>,
    %c0_64 = arith.constant 0 : index
    %c0_65 = arith.constant 0 : index
    %52 = vector.load %arg12[%c0_64, %c0_65] : memref<64x576xbf16, #tpu.memory_space<vmem>>, vector<64x576xbf16>
    %c0_66 = arith.constant 0 : index
    %c0_67 = arith.constant 0 : index
    %53 = vector.load %arg5[%c0_66, %c0_67] : memref<576x64xbf16, #tpu.memory_space<vmem>>, vector<576x64xbf16>
    %cst_68 = arith.constant dense<0.000000e+00> : vector<64x64xf32>
    %54 = tpu.matmul %52, %53, %cst_68 {dimension_numbers = #tpu.dot_dimension_numbers<[1], [0], [0], [1], [0, 0, 1, 1], [], []>} : vector<64x576xbf16>, vector<576x64xbf16>, vector<64x64xf32> -> vector<64x64xf32>
    %c0_69 = arith.constant 0 : index
    %c0_70 = arith.constant 0 : index
    %55 = vector.load %arg6[%c0_69, %c0_70] : memref<1x64xf32, #tpu.memory_space<vmem>>, vector<1x64xf32>
    %56 = vector.broadcast %55 : vector<1x64xf32> to vector<64x64xf32>
    %57 = arith.addf %54, %56 : vector<64x64xf32>
    %cst_71 = arith.constant 0.000000e+00 : f32
    %58 = vector.broadcast %cst_71 : f32 to vector<64x64xf32>
    %59 = arith.maximumf %57, %58 : vector<64x64xf32>
    %60 = arith.truncf %59 : vector<64x64xf32> to vector<64x64xbf16>
    %c0_72 = arith.constant 0 : index
    %c0_73 = arith.constant 0 : index
    %61 = vector.load %arg7[%c0_72, %c0_73] : memref<64x8xbf16, #tpu.memory_space<vmem>>, vector<64x8xbf16>
    %cst_74 = arith.constant dense<0.000000e+00> : vector<64x8xf32>
    %62 = tpu.matmul %60, %61, %cst_74 {dimension_numbers = #tpu.dot_dimension_numbers<[1], [0], [0], [1], [0, 0, 1, 1], [], []>} : vector<64x64xbf16>, vector<64x8xbf16>, vector<64x8xf32> -> vector<64x8xf32>
    %c0_75 = arith.constant 0 : index
    %c0_76 = arith.constant 0 : index
    %63 = vector.load %arg8[%c0_75, %c0_76] : memref<1x8xf32, #tpu.memory_space<vmem>>, vector<1x8xf32>
    %64 = vector.broadcast %63 : vector<1x8xf32> to vector<64x8xf32>
    %65 = arith.addf %62, %64 : vector<64x8xf32>
    %c0_77 = arith.constant 0 : index
    %c0_78 = arith.constant 0 : index
    %c0_79 = arith.constant 0 : index
    %66 = vector.load %arg9[%c0_77, %c0_78, %c0_79] : memref<1x64x8xf32, #tpu.memory_space<vmem>>, vector<1x64x8xf32>
    %67 = vector.shape_cast %66 : vector<1x64x8xf32> to vector<64x8xf32>
    %68 = vector.shape_cast %65 : vector<64x8xf32> to vector<1x64x8xf32>
    tpu.vector_store %arg9[%c0_77, %c0_78, %c0_79], %68 {strides = array<i32>} : memref<1x64x8xf32, #tpu.memory_space<vmem>>, vector<1x64x8xf32>,
    %69 = vector.shape_cast %65 : vector<64x8xf32> to vector<8x8x8xf32>
    %cst_80 = arith.constant 0xFF800000 : f32
    %70 = vector.broadcast %cst_80 : f32 to vector<1x16x8xf32>
    %cst_81 = arith.constant 0xFF800000 : f32
    %71 = vector.broadcast %cst_81 : f32 to vector<10x1x8xf32>
    %c0_82 = arith.constant 0 : index
    %c0_83 = arith.constant 0 : index
    %c0_84 = arith.constant 0 : index
    %72 = vector.load %arg13[%c0_82, %c0_83, %c0_84] : memref<10x16x8xf32, #tpu.memory_space<vmem>>, vector<1x16x8xf32>
    tpu.vector_store %arg13[%c0_82, %c0_83, %c0_84], %70 {strides = array<i32>} : memref<10x16x8xf32, #tpu.memory_space<vmem>>, vector<1x16x8xf32>,
    %c9_85 = arith.constant 9 : index
    %c0_86 = arith.constant 0 : index
    %c0_87 = arith.constant 0 : index
    %73 = vector.load %arg13[%c9_85, %c0_86, %c0_87] : memref<10x16x8xf32, #tpu.memory_space<vmem>>, vector<1x16x8xf32>
    tpu.vector_store %arg13[%c9_85, %c0_86, %c0_87], %70 {strides = array<i32>} : memref<10x16x8xf32, #tpu.memory_space<vmem>>, vector<1x16x8xf32>,
    %c0_88 = arith.constant 0 : index
    %c0_89 = arith.constant 0 : index
    %c0_90 = arith.constant 0 : index
    %74 = vector.load %arg13[%c0_88, %c0_89, %c0_90] : memref<10x16x8xf32, #tpu.memory_space<vmem>>, vector<10x1x8xf32>
    tpu.vector_store %arg13[%c0_88, %c0_89, %c0_90], %71 {strides = array<i32>} : memref<10x16x8xf32, #tpu.memory_space<vmem>>, vector<10x1x8xf32>,
    %c0_91 = arith.constant 0 : index
    %c9_92 = arith.constant 9 : index
    %c0_93 = arith.constant 0 : index
    %75 = vector.load %arg13[%c0_91, %c9_92, %c0_93] : memref<10x16x8xf32, #tpu.memory_space<vmem>>, vector<10x1x8xf32>
    tpu.vector_store %arg13[%c0_91, %c9_92, %c0_93], %71 {strides = array<i32>} : memref<10x16x8xf32, #tpu.memory_space<vmem>>, vector<10x1x8xf32>,
    %c1_94 = arith.constant 1 : index
    %c1_95 = arith.constant 1 : index
    %c0_96 = arith.constant 0 : index
    %76 = vector.load %arg13[%c1_94, %c1_95, %c0_96] : memref<10x16x8xf32, #tpu.memory_space<vmem>>, vector<8x8x8xf32>
    tpu.vector_store %arg13[%c1_94, %c1_95, %c0_96], %69 {strides = array<i32>} : memref<10x16x8xf32, #tpu.memory_space<vmem>>, vector<8x8x8xf32>,
    %c0_97 = arith.constant 0 : index
    %c0_98 = arith.constant 0 : index
    %c0_99 = arith.constant 0 : index
    %77 = vector.load %arg13[%c0_97, %c0_98, %c0_99] : memref<10x16x8xf32, #tpu.memory_space<vmem>>, vector<8x8x8xf32>
    %78 = arith.maximumf %69, %77 : vector<8x8x8xf32>
    %c0_100 = arith.constant 0 : index
    %c1_101 = arith.constant 1 : index
    %c0_102 = arith.constant 0 : index
    %79 = vector.load %arg13[%c0_100, %c1_101, %c0_102] : memref<10x16x8xf32, #tpu.memory_space<vmem>>, vector<8x8x8xf32>
    %80 = arith.maximumf %78, %79 : vector<8x8x8xf32>
    %c0_103 = arith.constant 0 : index
    %c2_104 = arith.constant 2 : index
    %c0_105 = arith.constant 0 : index
    %81 = vector.load %arg13[%c0_103, %c2_104, %c0_105] : memref<10x16x8xf32, #tpu.memory_space<vmem>>, vector<8x8x8xf32>
    %82 = arith.maximumf %80, %81 : vector<8x8x8xf32>
    %c1_106 = arith.constant 1 : index
    %c0_107 = arith.constant 0 : index
    %c0_108 = arith.constant 0 : index
    %83 = vector.load %arg13[%c1_106, %c0_107, %c0_108] : memref<10x16x8xf32, #tpu.memory_space<vmem>>, vector<8x8x8xf32>
    %84 = arith.maximumf %82, %83 : vector<8x8x8xf32>
    %c1_109 = arith.constant 1 : index
    %c2_110 = arith.constant 2 : index
    %c0_111 = arith.constant 0 : index
    %85 = vector.load %arg13[%c1_109, %c2_110, %c0_111] : memref<10x16x8xf32, #tpu.memory_space<vmem>>, vector<8x8x8xf32>
    %86 = arith.maximumf %84, %85 : vector<8x8x8xf32>
    %c2_112 = arith.constant 2 : index
    %c0_113 = arith.constant 0 : index
    %c0_114 = arith.constant 0 : index
    %87 = vector.load %arg13[%c2_112, %c0_113, %c0_114] : memref<10x16x8xf32, #tpu.memory_space<vmem>>, vector<8x8x8xf32>
    %88 = arith.maximumf %86, %87 : vector<8x8x8xf32>
    %c2_115 = arith.constant 2 : index
    %c1_116 = arith.constant 1 : index
    %c0_117 = arith.constant 0 : index
    %89 = vector.load %arg13[%c2_115, %c1_116, %c0_117] : memref<10x16x8xf32, #tpu.memory_space<vmem>>, vector<8x8x8xf32>
    %90 = arith.maximumf %88, %89 : vector<8x8x8xf32>
    %c2_118 = arith.constant 2 : index
    %c2_119 = arith.constant 2 : index
    %c0_120 = arith.constant 0 : index
    %91 = vector.load %arg13[%c2_118, %c2_119, %c0_120] : memref<10x16x8xf32, #tpu.memory_space<vmem>>, vector<8x8x8xf32>
    %92 = arith.maximumf %90, %91 : vector<8x8x8xf32>
    %93 = arith.cmpf oeq, %92, %69 : vector<8x8x8xf32>
    %94 = arith.extui %93 : vector<8x8x8xi1> to vector<8x8x8xi32>
    %95 = arith.sitofp %94 : vector<8x8x8xi32> to vector<8x8x8xf32>
    %96 = arith.mulf %69, %95 : vector<8x8x8xf32>
    %97 = vector.shape_cast %96 : vector<8x8x8xf32> to vector<64x8xf32>
    %c0_121 = arith.constant 0 : index
    %c0_122 = arith.constant 0 : index
    %c0_123 = arith.constant 0 : index
    %98 = vector.load %arg10[%c0_121, %c0_122, %c0_123] : memref<1x64x8xf32, #tpu.memory_space<vmem>>, vector<1x64x8xf32>
    %99 = vector.shape_cast %98 : vector<1x64x8xf32> to vector<64x8xf32>
    %100 = vector.shape_cast %97 : vector<64x8xf32> to vector<1x64x8xf32>
    tpu.vector_store %arg10[%c0_121, %c0_122, %c0_123], %100 {strides = array<i32>} : memref<1x64x8xf32, #tpu.memory_space<vmem>>, vector<1x64x8xf32>,
    return
  }
  func.func @transform_0(%arg0: i32) -> (i32, i32, i32) {
    %c0_i32 = arith.constant 0 : i32
    %c0_i32_0 = arith.constant 0 : i32
    %c0_i32_1 = arith.constant 0 : i32
    return %arg0, %c0_i32, %c0_i32_0 : i32, i32, i32
  }
  func.func @transform_1(%arg0: i32) -> (i32, i32) {
    %c0_i32 = arith.constant 0 : i32
    %c0_i32_0 = arith.constant 0 : i32
    %c0_i32_1 = arith.constant 0 : i32
    return %c0_i32, %c0_i32_0 : i32, i32
  }
  func.func @transform_2(%arg0: i32) -> (i32, i32) {
    %c0_i32 = arith.constant 0 : i32
    %c0_i32_0 = arith.constant 0 : i32
    %c0_i32_1 = arith.constant 0 : i32
    return %c0_i32, %c0_i32_0 : i32, i32
  }
  func.func @transform_3(%arg0: i32) -> (i32, i32) {
    %c0_i32 = arith.constant 0 : i32
    %c0_i32_0 = arith.constant 0 : i32
    %c0_i32_1 = arith.constant 0 : i32
    return %c0_i32, %c0_i32_0 : i32, i32
  }
  func.func @transform_4(%arg0: i32) -> (i32, i32) {
    %c0_i32 = arith.constant 0 : i32
    %c0_i32_0 = arith.constant 0 : i32
    %c0_i32_1 = arith.constant 0 : i32
    return %c0_i32, %c0_i32_0 : i32, i32
  }
  func.func @transform_5(%arg0: i32) -> (i32, i32) {
    %c0_i32 = arith.constant 0 : i32
    %c0_i32_0 = arith.constant 0 : i32
    %c0_i32_1 = arith.constant 0 : i32
    return %c0_i32, %c0_i32_0 : i32, i32
  }
  func.func @transform_6(%arg0: i32) -> (i32, i32) {
    %c0_i32 = arith.constant 0 : i32
    %c0_i32_0 = arith.constant 0 : i32
    %c0_i32_1 = arith.constant 0 : i32
    return %c0_i32, %c0_i32_0 : i32, i32
  }
  func.func @transform_7(%arg0: i32) -> (i32, i32) {
    %c0_i32 = arith.constant 0 : i32
    %c0_i32_0 = arith.constant 0 : i32
    %c0_i32_1 = arith.constant 0 : i32
    return %c0_i32, %c0_i32_0 : i32, i32
  }
  func.func @transform_8(%arg0: i32) -> (i32, i32, i32) {
    %c0_i32 = arith.constant 0 : i32
    %c0_i32_0 = arith.constant 0 : i32
    %c0_i32_1 = arith.constant 0 : i32
    return %arg0, %c0_i32, %c0_i32_0 : i32, i32, i32
  }
  func.func @transform_9(%arg0: i32) -> (i32, i32, i32) {
    %c0_i32 = arith.constant 0 : i32
    %c0_i32_0 = arith.constant 0 : i32
    %c0_i32_1 = arith.constant 0 : i32
    return %arg0, %c0_i32, %c0_i32_0 : i32, i32, i32
  }
}

</mosaic_0001>

<bundles_post_ra>
// kernel: tpu_custom_call.1
= control target key start
LH: loop header
LB: loop body
LE: loop exit
PB: predicated region body
PF: predicated region fallthrough
CT: control target
= control target key end

     0   :  { %s3693_s30 = smov 0   ;;  %s4442_s0 = inlined_call_operand.vmem [shape: bf16[2,64,256], index: 0, kind: input, shape index: {}]   ;;  %s4443_s1 = inlined_call_operand.vmem [shape: bf16[256,144], index: 1, kind: input, shape index: {}]   ;;  %s4444_s2 = inlined_call_operand.vmem [shape: bf16[144,64], index: 2, kind: input, shape index: {}]   ;;  %s4445_s3 = inlined_call_operand.vmem [shape: f32[1,64], index: 3, kind: input, shape index: {}]   ;;  %s4446_s4 = inlined_call_operand.vmem [shape: bf16[576,64], index: 4, kind: input, shape index: {}]   ;;  %s4447_s5 = inlined_call_operand.vmem [shape: f32[1,64], index: 5, kind: input, shape index: {}]   ;;  %s4448_s6 = inlined_call_operand.vmem [shape: bf16[64,8], index: 6, kind: input, shape index: {}]   ;;  %s4449_s7 = inlined_call_operand.vmem [shape: f32[1,8], index: 7, kind: input, shape index: {}]   ;;  %s4450_s8 = inlined_call_operand.vmem [shape: f32[2,64,8], index: 8, kind: output, shape index: {0}]   ;;  %s4451_s9 = inlined_call_operand.vmem [shape: f32[2,64,8], index: 9, kind: output, shape index: {1}]  }
   0x1 LB: > { %s2974_s10 = sadd.s32 4294967295, %s3637_s30   ;;  %p2978_p0 = scmp.ge.s32.totalorder %s3637_s30, 1  ;;  %s3637_s30 = sphi %s3693_s30, %s20_s30  }
   0x2   : > { %p290_p1 = scmp.lt.s32.totalorder %s3637_s30, 3 }
   0x4   : > { %p291_p2 = pnand %p2978_p0, %p290_p1 }
   0x5   : > { %v3414_v0 = vld [vmem:[%s4443_s1 + $0x4] ss:$8 sps:$4 sm:$0xff] (!%p291_p2)   ;;  %v3416_v1 = vld [vmem:[%s4443_s1] ss:$8 sps:$4 sm:$0xff] (!%p291_p2)   ;;  %v3639_v2 = vmov (!%p291_p2), 0   ;;  %p331_p3 = scmp.lt.s32.totalorder (!%p291_p2), %s2974_s10, 1 }
   0x6   : > { %294 = sbr.rel (%p291_p2) target bundleno = 1188 (0x4a4), region = 52  ;;  %776 = vmatprep.subr.bf16.mxu1 (!%p291_p2), %v3639_v2  ;;  %587 = vmatprep.subr.bf16.mxu0 (!%p291_p2), %v3414_v0  ;;  %v3417_v3 = vld [vmem:[%s4443_s1 + $0x14] ss:$8 sps:$4 sm:$0xff] (!%p291_p2)   ;;  %v3419_v4 = vld [vmem:[%s4443_s1 + $0x10] ss:$8 sps:$4 sm:$0xff] (!%p291_p2)   ;;  %v3474_v18 = vld [vmem:[%s4444_s2] sm:$0xff] (!%p291_p2)  }
   0x7   : > { %588 = vmatpush1.bf16.msra.mxu0 (!%p291_p2), %v3416_v1  ;;  %v3420_v5 = vld [vmem:[%s4443_s1 + $0x24] ss:$8 sps:$4 sm:$0xff] (!%p291_p2)   ;;  %v3422_v6 = vld [vmem:[%s4443_s1 + $0x20] ss:$8 sps:$4 sm:$0xff] (!%p291_p2)   ;;  %v3423_v7 = vld [vmem:[%s4443_s1 + $0x34] ss:$8 sps:$4 sm:$0xff] (!%p291_p2)   ;;  %777 = vmatpush1.bf16.msra.mxu1 (!%p291_p2), %v3474_v18 }
   0x8   : > { %589 = vmatprep.subr.bf16.mxu0 (!%p291_p2), %v3417_v3  ;;  %v3425_v8 = vld [vmem:[%s4443_s1 + $0x30] ss:$8 sps:$4 sm:$0xff] (!%p291_p2)   ;;  %v3426_v9 = vld [vmem:[%s4443_s1 + $0x44] ss:$8 sps:$4 sm:$0xff] (!%p291_p2)   ;;  %v3428_v10 = vld [vmem:[%s4443_s1 + $0x40] ss:$8 sps:$4 sm:$0xff] (!%p291_p2)   ;;  %778 = vmatprep.subr.bf16.mxu1 (!%p291_p2), %v3639_v2 }
   0x9   : > { %v3429_v11 = vld [vmem:[%s4443_s1 + $0x54] ss:$8 sps:$4 sm:$0xff] (!%p291_p2)   ;;  %v3431_v12 = vld [vmem:[%s4443_s1 + $0x50] ss:$8 sps:$4 sm:$0xff] (!%p291_p2)   ;;  %v3432_v13 = vld [vmem:[%s4443_s1 + $0x64] ss:$8 sps:$4 sm:$0xff] (!%p291_p2)  }
   0xa   : > { %v3434_v15 = vld [vmem:[%s4443_s1 + $0x60] ss:$8 sps:$4 sm:$0xff] (!%p291_p2)   ;;  %v3435_v16 = vld [vmem:[%s4443_s1 + $0x74] ss:$8 sps:$4 sm:$0xff] (!%p291_p2)   ;;  %v3437_v17 = vld [vmem:[%s4443_s1 + $0x70] ss:$8 sps:$4 sm:$0xff] (!%p291_p2)  }
   0xb   : > { %590 = vmatpush1.bf16.msra.mxu0 (!%p291_p2), %v3419_v4  ;;  %v3438_v19 = vld [vmem:[%s4443_s1 + $0x84] ss:$8 sps:$4 sm:$0xff] (!%p291_p2)   ;;  %v3440_v21 = vld [vmem:[%s4443_s1 + $0x80] ss:$8 sps:$4 sm:$0xff] (!%p291_p2)   ;;  %v3441_v22 = vld [vmem:[%s4443_s1 + $0x94] ss:$8 sps:$4 sm:$0xff] (!%p291_p2)  }
   0xc   : > { %591 = vmatprep.subr.bf16.mxu0 (!%p291_p2), %v3420_v5  ;;  %v3475_v20 = vld [vmem:[%s4444_s2 + $0x8] sm:$0xff] (!%p291_p2)   ;;  %v3443_v23 = vld [vmem:[%s4443_s1 + $0x90] ss:$8 sps:$4 sm:$0xff] (!%p291_p2)   ;;  %v3447_v28 = vld [vmem:[%s4443_s1 + $0xb4] ss:$8 sps:$4 sm:$0xff] (!%p291_p2)   ;;  %vm763_vm0 = vcmask (!%p291_p2), 130048  }
   0xd   : > { %s4463_s10 = smov (!%p331_p3, %s2974_s10), 1  ;;  %779 = vmatpush1.bf16.msra.mxu1 %v3475_v20  ;;  %v3476_v24 = vld [vmem:[%s4444_s2 + $0x10] sm:$0xff]   ;;  %v3444_v25 = vld [vmem:[%s4443_s1 + $0xa4] ss:$8 sps:$4 sm:$0xff]   ;;  %v3477_v26 = vld [vmem:[%s4444_s2 + $0x18] sm:$0xff]   ;;  %vm857_vm1 = vcmask 516096  }
   0xe   : > { %s3735_s14 = sshll.u32 %s4463_s10, 6  ;;  %780 = vmatprep.subr.bf16.mxu1 %v3639_v2  ;;  %v3446_v27 = vld [vmem:[%s4443_s1 + $0xa0] ss:$8 sps:$4 sm:$0xff]   ;;  %v3449_v30 = vld [vmem:[%s4443_s1 + $0xb0] ss:$8 sps:$4 sm:$0xff]   ;;  %vm890_vm3 = vcmask 520196  }
   0xf   : > { %592 = vmatpush1.bf16.msra.mxu0 %v3422_v6  ;;  %s3744_s19 = scalar_lea.vmem %s4442_s0, %s3735_s14  ;;  %v3478_v29 = vld [vmem:[%s4444_s2 + $0x20] sm:$0xff]   ;;  %v3479_v32 = vld [vmem:[%s4444_s2 + $0x28] sm:$0xff]   ;;  %v3453_v34 = vld [vmem:[%s4443_s1 + $0xd4] ss:$8 sps:$4 sm:$0xff]   ;;  %vm858_vm2 = vsmask.f32 256  ;;  %s4310_s17 = scalar_lea.vmem %s4450_s8, %s3735_s14 }
  0x10   : > { %593 = vmatprep.subr.bf16.mxu0 %v3423_v7  ;;  %v3464_v14 = vld [vmem:[%s3744_s19 + $0x4] ss:$8 sps:$4 sm:$0xff]   ;;  %v3452_v33 = vld [vmem:[%s4443_s1 + $0xc0] ss:$8 sps:$4 sm:$0xff]   ;;  %v3480_v35 = vld [vmem:[%s4444_s2 + $0x30] sm:$0xff]   ;;  %vm853_vm7 = vcmask 523264   ;;  %s4392_s21 = scalar_lea.vmem %s4451_s9, %s3735_s14 }
  0x11   : > { %619 = vmatprep.mubr.bf16.mxu0 %v3464_v14  ;;  %781 = vmatpush1.bf16.msra.mxu1 %v3476_v24  ;;  %v3450_v31 = vld [vmem:[%s4443_s1 + $0xc4] ss:$8 sps:$4 sm:$0xff]   ;;  %v3455_v36 = vld [vmem:[%s4443_s1 + $0xd0] ss:$8 sps:$4 sm:$0xff]   ;;  %v3458_v38 = vld [vmem:[%s4443_s1 + $0xe0] ss:$8 sps:$4 sm:$0xff]  }
  0x12   : > { %782 = vmatprep.subr.bf16.mxu1 %v3639_v2  ;;  %v3456_v37 = vld [vmem:[%s4443_s1 + $0xe4] ss:$8 sps:$4 sm:$0xff]   ;;  %v3459_v39 = vld [vmem:[%s4443_s1 + $0xf4] ss:$8 sps:$4 sm:$0xff]   ;;  %v3461_v40 = vld [vmem:[%s4443_s1 + $0xf0] ss:$8 sps:$4 sm:$0xff]  }
  0x13   : > { %594 = vmatpush1.bf16.msra.mxu0 %v3425_v8  ;;  %v3462_v41 = vld [vmem:[%s3744_s19] ss:$8 sps:$4 sm:$0xff]   ;;  %v3465_v42 = vld [vmem:[%s3744_s19 + $0x14] ss:$8 sps:$4 sm:$0xff]   ;;  %v3467_v43 = vld [vmem:[%s3744_s19 + $0x10] ss:$8 sps:$4 sm:$0xff]  }
  0x14   : > { %595 = vmatprep.subr.bf16.mxu0 %v3426_v9  ;;  %v3468_v44 = vld [vmem:[%s3744_s19 + $0x24] ss:$8 sps:$4 sm:$0xff]   ;;  %v3470_v45 = vld [vmem:[%s3744_s19 + $0x20] ss:$8 sps:$4 sm:$0xff]   ;;  %v3471_v46 = vld [vmem:[%s3744_s19 + $0x34] ss:$8 sps:$4 sm:$0xff]  }
  0x15   : > { %783 = vmatpush1.bf16.msra.mxu1 %v3477_v26  ;;  %v3473_v47 = vld [vmem:[%s3744_s19 + $0x30] ss:$8 sps:$4 sm:$0xff]   ;;  %v3482_v49 = vld [vmem:[%s4444_s2 + $0x40] sm:$0xff]   ;;  %vm891_vm4 = vsmask.f32 7954  ;;  %vm3853_vm5 = vmand %vm857_vm1, %vm858_vm2  ;;  %854 = vst.msk [vmem:[#allocation2] sm:$0xff] %vm853_vm7, %v3639_v2 }
  0x16   : > { %784 = vmatprep.subr.bf16.mxu1 %v3639_v2  ;;  %v3481_v48 = vld [vmem:[%s4444_s2 + $0x38] sm:$0xff]   ;;  %vm3859_vm6 = vmand %vm890_vm3, %vm891_vm4  ;;  %856 = vst.msk [vmem:[#allocation2 + $0x48] sm:$0xff] %vm853_vm7, %v3639_v2  ;;  %vm1008_vm8 = vcmask 520192   ;;  %vm1009_vm9 = vsmask.f32 4354  ;;  %vm1311_vm13 = vcmask 1042432  }
  0x17   : > { %596 = vmatpush1.bf16.msra.mxu0 %v3428_v10  ;;  %vm3946_vm10 = vmand %vm1008_vm8, %vm1009_vm9  ;;  %vm1119_vm11 = vsmask.f32 3328  ;;  %vm1120_vm12 = vsmask.f32 7440  ;;  %vm1312_vm14 = vcmask 1046532   ;;  %s3640_s24 = smov 64  }
  0x18   : > { %597 = vmatprep.subr.bf16.mxu0 %v3429_v11  ;;  %vm3982_vm15 = vmor %vm1119_vm11, %vm1120_vm12  ;;  %vm1258_vm1 = vcmask 1048064   ;;  %vm2673_vm2 = vcmask 64512   ;;  %vm2687_vm3 = vcmask 57344  }
  0x19   : > { %785 = vmatpush1.bf16.msra.mxu1 %v3478_v29  ;;  %v896_v29 = vld [vmem:[#allocation2 + $0x8] sm:$0x10] }
  0x1a   : > { %786 = vmatprep.subr.bf16.mxu1 %v3639_v2 }
  0x1b   : > { %598 = vmatpush1.bf16.msra.mxu0 %v3431_v12 }
  0x1c   : > { %599 = vmatprep.subr.bf16.mxu0 %v3432_v13 }
  0x1d   : > { %787 = vmatpush1.bf16.msra.mxu1 %v3479_v32  ;;  %v897_v32 = vsel %vm3859_vm6, 0, %v896_v29 }
  0x1e   : > { %788 = vmatprep.subr.bf16.mxu1 %v3639_v2  ;;  %898 = vst [vmem:[#allocation2 + $0x8] sm:$0x10] %v897_v32 }
  0x1f   : > { %600 = vmatpush1.bf16.msra.mxu0 %v3434_v15 }
  0x20   : > { %601 = vmatprep.subr.bf16.mxu0 %v3435_v16 }
  0x21   : > { %789 = vmatpush1.bf16.msra.mxu1 %v3480_v35 }
  0x22   : > { %790 = vmatprep.subr.bf16.mxu1 %v3639_v2 }
  0x23   : > { %602 = vmatpush1.bf16.msra.mxu0 %v3437_v17 }
  0x24   : > { %603 = vmatprep.subr.bf16.mxu0 %v3438_v19 }
  0x25   : > { %791 = vmatpush1.bf16.msra.mxu1 %v3481_v48  ;;  %v875_v48 = vld [vmem:[#allocation2 + $0x28] sm:$0x1] }
  0x26   : > { %792 = vmatprep.subr.bf16.mxu1 %v3639_v2  ;;  %v872_v2 = vld [vmem:[#allocation2 + $0x20] sm:$0x1] }
  0x27   : > { %604 = vmatpush1.bf16.msra.mxu0 %v3440_v21 }
  0x28   : > { %605 = vmatprep.subr.bf16.mxu0 %v3441_v22 }
  0x29   : > { %793 = vmatpush1.bf16.msra.mxu1 %v3482_v49  ;;  %v908_v49 = vld [vmem:[#allocation2 + $0x28] sm:$0x10] }
  0x2b   : > { %606 = vmatpush1.bf16.msra.mxu0 %v3443_v23 }
  0x2c   : > { %607 = vmatprep.subr.bf16.mxu0 %v3444_v25 }
  0x2f   : > { %608 = vmatpush1.bf16.msra.mxu0 %v3446_v27 }
  0x30   : > { %609 = vmatprep.subr.bf16.mxu0 %v3447_v28  ;;  %v863_v28 = vld [vmem:[#allocation2 + $0x8] sm:$0x1] }
  0x33   : > { %610 = vmatpush1.bf16.msra.mxu0 %v3449_v30  ;;  %v864_v30 = vsel %vm3853_vm5, 0, %v863_v28 }
  0x34   : > { %611 = vmatprep.subr.bf16.mxu0 %v3450_v31  ;;  %865 = vst [vmem:[#allocation2 + $0x8] sm:$0x1] %v864_v30 }
  0x37   : > { %612 = vmatpush1.bf16.msra.mxu0 %v3452_v33  ;;  %v866_v33 = vld [vmem:[#allocation2 + $0x10] sm:$0x1] }
  0x38   : > { %613 = vmatprep.subr.bf16.mxu0 %v3453_v34  ;;  %v899_v34 = vld [vmem:[#allocation2 + $0x10] sm:$0x10]  ;;  %v867_v35 = vsel %vm3853_vm5, 0, %v866_v33 }
  0x39   : > { %868 = vst [vmem:[#allocation2 + $0x10] sm:$0x1] %v867_v35 }
  0x3b   : > { %614 = vmatpush1.bf16.msra.mxu0 %v3455_v36  ;;  %v900_v36 = vsel %vm3859_vm6, 0, %v899_v34 }
  0x3c   : > { %615 = vmatprep.subr.bf16.mxu0 %v3456_v37  ;;  %901 = vst [vmem:[#allocation2 + $0x10] sm:$0x10] %v900_v36  ;;  %v869_v37 = vld [vmem:[#allocation2 + $0x18] sm:$0x1] }
  0x3f   : > { %616 = vmatpush1.bf16.msra.mxu0 %v3458_v38  ;;  %v870_v38 = vsel %vm3853_vm5, 0, %v869_v37 }
  0x40   : > { %617 = vmatprep.subr.bf16.mxu0 %v3459_v39  ;;  %v902_v39 = vld [vmem:[#allocation2 + $0x18] sm:$0x10]  ;;  %871 = vst [vmem:[#allocation2 + $0x18] sm:$0x1] %v870_v38  ;;  %v1011_v38 = vld [vmem:[#allocation2 + $0x8] sm:$0x1f] }
  0x43   : > { %618 = vmatpush1.bf16.msra.mxu0 %v3461_v40  ;;  %v860_v40 = vld [vmem:[#allocation2] sm:$0x1] }
  0x46   : > { %620 = vmatmul.mubr.bf16.vlgmr.msra.gmra.mrb[0].mxu0 %v3462_v41  ;;  %v903_v41 = vsel %vm3859_vm6, 0, %v902_v39 }
  0x47   : > { %629 = vmatprep.mubr.bf16.mxu0 %v3465_v42  ;;  %v861_v42 = vsel %vm3853_vm5, 0, %v860_v40  ;;  %904 = vst [vmem:[#allocation2 + $0x18] sm:$0x10] %v903_v41 }
  0x48   : > { %862 = vst [vmem:[#allocation2] sm:$0x1] %v861_v42 }
  0x4e   : > { %630 = vmatmul.mubr.bf16.gmra.mrb[4].mxu0 %v3467_v43  ;;  %v873_v43 = vsel %vm3853_vm5, 0, %v872_v2 }
  0x4f   : > { %639 = vmatprep.mubr.bf16.mxu0 %v3468_v44  ;;  %v905_v44 = vld [vmem:[#allocation2 + $0x20] sm:$0x10]  ;;  %874 = vst [vmem:[#allocation2 + $0x20] sm:$0x1] %v873_v43 }
  0x56   : > { %640 = vmatmul.mubr.bf16.gmra.mrb[8].mxu0 %v3470_v45  ;;  %v906_v45 = vsel %vm3859_vm6, 0, %v905_v44 }
  0x57   : > { %649 = vmatprep.mubr.bf16.mxu0 %v3471_v46  ;;  %v893_v46 = vld [vmem:[#allocation2] sm:$0x10]  ;;  %907 = vst [vmem:[#allocation2 + $0x20] sm:$0x10] %v906_v45 }
  0x5e   : > { %650 = vmatmul.mubr.bf16.gmra.mrb[12].mxu0 %v3473_v47  ;;  %v894_v47 = vsel %vm3859_vm6, 0, %v893_v46 }
  0x5f   : > { %895 = vst [vmem:[#allocation2] sm:$0x10] %v894_v47 }
 0x119   : > { %v621_v50 = vpop.f32.mrb[0].mxu0 }
 0x11a   : > { %v623_v51 = vpop.f32.mrb[1].mxu0  ;;  %v660_v53 = vmax.f32 %v621_v50, 0.0  ;;  %v876_v50 = vsel %vm3853_vm5, 0, %v875_v48  ;;  %v1263_v48 = vld [vmem:[#allocation2] sm:$0x1e] }
 0x11b   : > { %v625_v52 = vpop.f32.mrb[2].mxu0  ;;  %v661_v56 = vmax.f32 %v623_v51, 0.0  ;;  %v909_v51 = vsel %vm3859_vm6, 0, %v908_v49  ;;  %877 = vst [vmem:[#allocation2 + $0x28] sm:$0x1] %v876_v50 }
 0x11c   : > { %v662_v54 = vmax.f32 %v625_v52, 0.0  ;;  %v627_v55 = vpop.f32.mrb[3].mxu0  ;;  %910 = vst [vmem:[#allocation2 + $0x28] sm:$0x10] %v909_v51  ;;  %v878_v52 = vld [vmem:[#allocation2 + $0x30] sm:$0x1] }
 0x11d   : > { %v663_v57 = vmax.f32 %v627_v55, 0.0 }
 0x11e   : > { %v676_v58 = vpack.c.bf16 %v662_v54, %v660_v53  ;;  %v911_v53 = vld [vmem:[#allocation2 + $0x30] sm:$0x10]  ;;  %v879_v54 = vsel %vm3853_vm5, 0, %v878_v52 }
 0x11f   : > { %v677_v59 = vpack.c.bf16 %v663_v57, %v661_v56  ;;  %v912_v55 = vsel %vm3859_vm6, 0, %v911_v53  ;;  %880 = vst [vmem:[#allocation2 + $0x30] sm:$0x1] %v879_v54  ;;  %v881_v56 = vld [vmem:[#allocation2 + $0x38] sm:$0x1] }
 0x120   : > { %913 = vst [vmem:[#allocation2 + $0x30] sm:$0x10] %v912_v55  ;;  %v914_v57 = vld [vmem:[#allocation2 + $0x38] sm:$0x10]  ;;  %v1014_v55 = vld [vmem:[#allocation2 + $0x10] sm:$0x1f] }
 0x121   : > { %v631_v60 = vpop.f32.mrb[4].mxu0  ;;  %3035 = vmatprep.mubr.msk.bf16.mxu1 %vm763_vm0, %v677_v59  ;;  %v915_v59 = vsel %vm3859_vm6, 0, %v914_v57 }
 0x122   : > { %v633_v61 = vpop.f32.mrb[5].mxu0  ;;  %809 = vmatmul.mubr.bf16.vlgmr.msra.gmra.mrb[0].mxu1 %v676_v58  ;;  %v664_v63 = vmax.f32 %v631_v60, 0.0  ;;  %v882_v58 = vsel %vm3853_vm5, 0, %v881_v56  ;;  %916 = vst [vmem:[#allocation2 + $0x38] sm:$0x10] %v915_v59 }
 0x123   : > { %v635_v62 = vpop.f32.mrb[6].mxu0  ;;  %v665_v3 = vmax.f32 %v633_v61, 0.0  ;;  %883 = vst [vmem:[#allocation2 + $0x38] sm:$0x1] %v882_v58  ;;  %v884_v60 = vld [vmem:[#allocation2 + $0x40] sm:$0x1] }
 0x124   : > { %v666_v0 = vmax.f32 %v635_v62, 0.0  ;;  %v637_v1 = vpop.f32.mrb[7].mxu0  ;;  %v917_v61 = vld [vmem:[#allocation2 + $0x40] sm:$0x10]  ;;  %v885_v62 = vsel %vm3853_vm5, 0, %v884_v60 }
 0x125   : > { %v667_v4 = vmax.f32 %v637_v1, 0.0  ;;  %886 = vst [vmem:[#allocation2 + $0x40] sm:$0x1] %v885_v62  ;;  %v920_v1 = vld [vmem:[#allocation2 + $0x48] sm:$0x10]  ;;  %v3072_v62 = vcombine.high %v1263_v48, %v1263_v48 }
 0x126   : > { %v678_v5 = vpack.c.bf16 %v666_v0, %v664_v63  ;;  %v918_v63 = vsel %vm3859_vm6, 0, %v917_v61  ;;  %v887_v0 = vld [vmem:[#allocation2 + $0x48] sm:$0x1]  ;;  %v3071_v61 = vcombine.low %v1263_v48, %v1263_v48 }
 0x127   : > { %v679_v6 = vpack.c.bf16 %v667_v4, %v665_v3  ;;  %919 = vst [vmem:[#allocation2 + $0x40] sm:$0x10] %v918_v63  ;;  %v888_v3 = vsel %vm3853_vm5, 0, %v887_v0  ;;  %v921_v4 = vsel %vm3859_vm6, 0, %v920_v1  ;;  %v3549_v63 = vld [vmem:[%s4446_s4 + $0x60] sm:$0xff]   ;;  %v3551_v1 = vld [vmem:[%s4446_s4 + $0xc8] sm:$0xff]  }
 0x128   : > { %889 = vst [vmem:[#allocation2 + $0x48] sm:$0x1] %v888_v3  ;;  %922 = vst [vmem:[#allocation2 + $0x48] sm:$0x10] %v921_v4  ;;  %v3550_v0 = vld [vmem:[%s4446_s4 + $0x20] sm:$0xff]  }
 0x129   : > { %v641_v7 = vpop.f32.mrb[8].mxu0  ;;  %3036 = vmatprep.mubr.msk.bf16.mxu1 %vm763_vm0, %v679_v6  ;;  %v3536_v6 = vld [vmem:[%s4446_s4] sm:$0xff]  }
 0x12a   : > { %v643_v8 = vpop.f32.mrb[9].mxu0  ;;  %817 = vmatmul.mubr.bf16.gmra.mrb[4].mxu1 %v678_v5  ;;  %v668_v10 = vmax.f32 %v641_v7, 0.0  ;;  %v3535_v5 = vld [vmem:[%s4446_s4 + $0x40] sm:$0xff]   ;;  %v3537_v7 = vld [vmem:[%s4446_s4 + $0x48] sm:$0xff]  }
 0x12b   : > { %v645_v9 = vpop.f32.mrb[10].mxu0  ;;  %v669_v13 = vmax.f32 %v643_v8, 0.0  ;;  %3274 = vmatprep.subr.bf16.mxu1 %v3535_v5  ;;  %v3543_v8 = vld [vmem:[%s4446_s4 + $0xc0] sm:$0xff]  }
 0x12c   : > { %v670_v11 = vmax.f32 %v645_v9, 0.0  ;;  %v647_v12 = vpop.f32.mrb[11].mxu0  ;;  %3275 = vmatpush3.bf16.msra.mxu1 %v3536_v6  ;;  %v3538_v9 = vld [vmem:[%s4446_s4 + $0x8] sm:$0xff]   ;;  %3314 = vmatprep.subr.bf16.mxu0 %v3543_v8 }
 0x12d   : > { %v671_v14 = vmax.f32 %v647_v12, 0.0  ;;  %3276 = vmatprep.subr.bf16.mxu1 %v3537_v7  ;;  %v3540_v12 = vld [vmem:[%s4446_s4 + $0x10] sm:$0xff]   ;;  %v3552_v7 = vld [vmem:[%s4446_s4 + $0x88] sm:$0xff]  }
 0x12e   : > { %v680_v15 = vpack.c.bf16 %v670_v11, %v668_v10  ;;  %v3544_v10 = vld [vmem:[%s4446_s4 + $0x80] sm:$0xff]   ;;  %v3539_v11 = vld [vmem:[%s4446_s4 + $0x50] sm:$0xff]   ;;  %v3553_v8 = vld [vmem:[%s4446_s4 + $0x68] sm:$0xff]  }
 0x12f   : > { %v681_v16 = vpack.c.bf16 %v671_v14, %v669_v13  ;;  %3315 = vmatpush3.bf16.msra.mxu0 %v3544_v10  ;;  %v3541_v13 = vld [vmem:[%s4446_s4 + $0x58] sm:$0xff]   ;;  %v3555_v10 = vld [vmem:[%s4446_s4 + $0xd0] sm:$0xff]  }
 0x130   : > { %3277 = vmatpush3.bf16.msra.mxu1 %v3538_v9  ;;  %v3542_v14 = vld [vmem:[%s4446_s4 + $0x18] sm:$0xff]   ;;  %3316 = vmatprep.subr.bf16.mxu0 %v3551_v1 }
 0x131   : > { %v651_v17 = vpop.f32.mrb[12].mxu0  ;;  %3037 = vmatprep.mubr.msk.bf16.mxu1 %vm763_vm0, %v681_v16  ;;  %3278 = vmatprep.subr.bf16.mxu1 %v3539_v11  ;;  %v1742_v16 = vld [vmem:[#allocation2 + $0x48] sm:$0x1f] }
 0x132   : > { %v653_v18 = vpop.f32.mrb[13].mxu0  ;;  %825 = vmatmul.mubr.bf16.gmra.mrb[8].mxu1 %v680_v15  ;;  %v672_v20 = vmax.f32 %v651_v17, 0.0  ;;  %v1071_v15 = vld [vmem:[#allocation2] sm:$0x1f]  ;;  %v3170_v41 = vcombine.high %v1742_v16, %v1742_v16 }
 0x133   : > { %v655_v19 = vpop.f32.mrb[14].mxu0  ;;  %v673_v23 = vmax.f32 %v653_v18, 0.0  ;;  %v3938_v17 = vld [vmem:[%s4445_s3] ss:$0 sm:$0xff]  ;;  %v3051_v18 = vcombine.low %v1071_v15, %v1071_v15  ;;  %v3052_v29 = vcombine.high %v1071_v15, %v1071_v15  ;;  %3317 = vmatpush3.bf16.msra.mxu0 %v3552_v7  ;;  %v3554_v15 = vld [vmem:[%s4446_s4 + $0x28] sm:$0xff]  }
 0x134   : > { %v674_v21 = vmax.f32 %v655_v19, 0.0  ;;  %v657_v22 = vpop.f32.mrb[15].mxu0  ;;  %3279 = vmatpush3.bf16.msra.mxu1 %v3540_v12  ;;  %v1891_v60 = vshll.u32 %v3170_v41, 16  ;;  %3318 = vmatprep.subr.bf16.mxu0 %v3555_v10  ;;  %v1020_v41 = vld [vmem:[#allocation2 + $0x20] sm:$0x1f] }
 0x135   : > { %v675_v24 = vmax.f32 %v657_v22, 0.0  ;;  %3280 = vmatprep.subr.bf16.mxu1 %v3541_v13  ;;  %v3942_v40 = vshll.u32 %v3052_v29, 16 }
 0x136   : > { %v682_v25 = vpack.c.bf16 %v674_v21, %v672_v20  ;;  %v3169_v20 = vcombine.low %v1742_v16, %v1742_v16  ;;  %v3556_v16 = vld [vmem:[%s4446_s4 + $0x90] sm:$0xff]  }
 0x137   : > { %v683_v26 = vpack.c.bf16 %v675_v24, %v673_v23  ;;  %v1123_v24 = vshrl.u32 %v3051_v18, 16  ;;  %v1134_v9 = vrot.slane %v3942_v40, 5  ;;  %3319 = vmatpush3.bf16.msra.mxu0 %v3556_v16 }
 0x138   : > { %3281 = vmatpush3.bf16.msra.mxu1 %v3542_v14  ;;  %v1882_v30 = vshrl.u32 %v3169_v20, 16  ;;  %v1885_v31 = vshll.u32 %v3169_v20, 16 }
 0x139   : > { %3038 = vmatprep.mubr.msk.bf16.mxu1 %vm763_vm0, %v683_v26  ;;  %v1125_v34 = vrot.slane %v1123_v24, 4  ;;  %3282 = vmatprep.subr.bf16.mxu1 %v3549_v63  ;;  %v3988_v24 = vrot.slane %v3072_v62, 5  ;;  %vm3993_vm0 = vmor %vm1311_vm13, %vm1312_vm14 }
 0x13a   : > { %833 = vmatmul.mubr.bf16.gmra.mrb[12].mxu1 %v682_v25  ;;  %v1126_v25 = vshll.u32 %v3051_v18, 16  ;;  %v1884_v2 = vrot.slane %v1882_v30, 4  ;;  %v1887_v42 = vrot.slane %v1885_v31, 5  ;;  %v1930_v18 = vld [vmem:[#allocation2 + $0x48] sm:$0x1e] }
 0x13b   : > { %v1017_v31 = vld [vmem:[#allocation2 + $0x18] sm:$0x1f]  ;;  %v3587_v30 = vld [vmem:[%s4446_s4 + $0x108] sm:$0xff]  }
 0x13c   : > { %v1128_v35 = vrot.slane %v1126_v25, 5  ;;  %v1888_v59 = vor.u32 %v1887_v42, %v1884_v2  ;;  %3283 = vmatpush3.bf16.msra.mxu1 %v3550_v0 }
 0x13d   : > { %3284 = vmatprep.subr.bf16.mxu1 %v3553_v8 }
 0x13e   : > { %v1129_v52 = vor.u32 %v1128_v35, %v1125_v34  ;;  %v3189_v34 = vcombine.low %v1930_v18, %v1930_v18  ;;  %v3190_v35 = vcombine.high %v1930_v18, %v1930_v18  ;;  %v1026_v18 = vld [vmem:[#allocation2 + $0x30] sm:$0x1f] }
 0x140   : > { %v1130_v14 = vrot.slane %v1129_v52, 4  ;;  %3285 = vmatpush3.bf16.msra.mxu1 %v3554_v15 }
 0x142   : > { %v4000_v2 = vsel %vm3982_vm15, %v1130_v14, %v1134_v9  ;;  %v1023_v9 = vld [vmem:[#allocation2 + $0x28] sm:$0x1f] }
 0x1f5   : > { %v810_v19 = vpop.f32.mrb[0].mxu1 }
 0x1f6   : > { %v811_v21 = vadd.f32 %v3938_v17, %v810_v19  ;;  %v812_v22 = vpop.f32.mrb[1].mxu1 }
 0x1f7   : > { %v813_v23 = vpop.f32.mrb[2].mxu1  ;;  %v1893_v22 = vrot.slane %v1891_v60, 5 }
 0x1f8   : > { %v841_v26 = vmax.f32 %v811_v21, 0.0  ;;  %v814_v27 = vadd.f32 %v3938_v17, %v813_v23  ;;  %v815_v28 = vpop.f32.mrb[3].mxu1  ;;  %v1889_v21 = vrot.slane %v1888_v59, 4  ;;  %v3986_v23 = vrot.slane %v3071_v61, 9 }
 0x1fa   : > { %v3266_v32 = vpack.c.bf16 %v841_v26, %v841_v26  ;;  %v842_v33 = vmax.f32 %v814_v27, 0.0  ;;  %v4004_v42 = vsel %vm3982_vm15, %v1889_v21, %v1893_v22 }
 0x1fc   : > { %v944_v36 = vshrl.u32 %v3266_v32, 16  ;;  %v3267_v37 = vpack.c.bf16 %v842_v33, %v842_v33  ;;  %v947_v44 = vshll.u32 %v3266_v32, 16 }
 0x1fd   : > { %v818_v39 = vpop.f32.mrb[4].mxu1 }
 0x1fe   : > { %v946_v43 = vrot.slane %v944_v36, 7  ;;  %v951_v45 = vshrl.u32 %v3267_v37, 16  ;;  %v819_v46 = vadd.f32 %v3938_v17, %v818_v39  ;;  %v820_v47 = vpop.f32.mrb[5].mxu1  ;;  %v954_v50 = vshll.u32 %v3267_v37, 16 }
 0x1ff   : > { %v821_v51 = vpop.f32.mrb[6].mxu1 }
 0x200   : > { %v949_v53 = vor.u32 %v947_v44, %v946_v43  ;;  %v953_v54 = vrot.slane %v951_v45, 7  ;;  %v843_v56 = vmax.f32 %v819_v46, 0.0  ;;  %v822_v57 = vadd.f32 %v3938_v17, %v821_v51  ;;  %v823_v58 = vpop.f32.mrb[7].mxu1  ;;  %v3561_v44 = vld [vmem:[%s4446_s4 + $0x70] sm:$0xff]  }
 0x201   : > { %v1317_v43 = vsel %vm3993_vm0, %v3986_v23, %v3988_v24  ;;  %3286 = vmatprep.subr.bf16.mxu1 %v3561_v44 }
 0x202   : > { %v1012_v3 = vsel %vm3946_vm10, %v949_v53, %v1011_v38  ;;  %v956_v4 = vor.u32 %v954_v50, %v953_v54  ;;  %v3268_v5 = vpack.c.bf16 %v843_v56, %v843_v56  ;;  %v844_v6 = vmax.f32 %v822_v57, 0.0 }
 0x203   : > { %1013 = vst [vmem:[#allocation2 + $0x8] sm:$0x1f] %v1012_v3  ;;  %v4017_v54 = vrot.slane %v3189_v34, 9 }
 0x204   : > { %v1015_v11 = vsel %vm3946_vm10, %v956_v4, %v1014_v55  ;;  %v958_v12 = vshrl.u32 %v3268_v5, 16  ;;  %v3269_v13 = vpack.c.bf16 %v844_v6, %v844_v6  ;;  %v961_v26 = vshll.u32 %v3268_v5, 16 }
 0x205   : > { %1016 = vst [vmem:[#allocation2 + $0x10] sm:$0x1f] %v1015_v11  ;;  %v826_v19 = vpop.f32.mrb[8].mxu1  ;;  %v4019_v55 = vrot.slane %v3190_v35, 5 }
 0x206   : > { %v960_v25 = vrot.slane %v958_v12, 7  ;;  %v965_v27 = vshrl.u32 %v3269_v13, 16  ;;  %v827_v28 = vadd.f32 %v3938_v17, %v826_v19  ;;  %v828_v29 = vpop.f32.mrb[9].mxu1  ;;  %v968_v32 = vshll.u32 %v3269_v13, 16 }
 0x207   : > { %v829_v33 = vpop.f32.mrb[10].mxu1 }
 0x208   : > { %v963_v36 = vor.u32 %v961_v26, %v960_v25  ;;  %v967_v37 = vrot.slane %v965_v27, 7  ;;  %v845_v38 = vmax.f32 %v827_v28, 0.0  ;;  %v830_v39 = vadd.f32 %v3938_v17, %v829_v33  ;;  %v831_v40 = vpop.f32.mrb[11].mxu1  ;;  %v3563_v25 = vld [vmem:[%s4446_s4 + $0x30] sm:$0xff]   ;;  %v3565_v33 = vld [vmem:[%s4446_s4 + $0x98] sm:$0xff]  }
 0x209   : > { %3287 = vmatpush3.bf16.msra.mxu1 %v3563_v25 }
 0x20a   : > { %v1018_v45 = vsel %vm3946_vm10, %v963_v36, %v1017_v31  ;;  %v970_v46 = vor.u32 %v968_v32, %v967_v37  ;;  %v3270_v47 = vpack.c.bf16 %v845_v38, %v845_v38  ;;  %v846_v48 = vmax.f32 %v830_v39, 0.0  ;;  %v1072_v50 = vld [vmem:[#allocation2 + $0x8] sm:$0x1f]  ;;  %v3564_v32 = vld [vmem:[%s4446_s4 + $0xd8] sm:$0xff]  }
 0x20b   : > { %1019 = vst [vmem:[#allocation2 + $0x18] sm:$0x1f] %v1018_v45  ;;  %v3053_v51 = vcombine.low %v1072_v50, %v1072_v50  ;;  %v3054_v52 = vcombine.high %v1072_v50, %v1072_v50  ;;  %v4015_v53 = vld [vmem:[#allocation2 + $0x8] sm:$0x1e]  ;;  %v3566_v38 = vld [vmem:[%s4446_s4 + $0x78] sm:$0xff]   ;;  %3320 = vmatprep.subr.bf16.mxu0 %v3564_v32 }
 0x20c   : > { %v1021_v56 = vsel %vm3946_vm10, %v970_v46, %v1020_v41  ;;  %v972_v57 = vshrl.u32 %v3270_v47, 16  ;;  %v975_v58 = vshll.u32 %v3270_v47, 16  ;;  %v3271_v59 = vpack.c.bf16 %v846_v48, %v846_v48  ;;  %v3483_v60 = vld [vmem:[#allocation2 + $0x8] ss:$8 sps:$4 sm:$0xff]   ;;  %3321 = vmatpush3.bf16.msra.mxu0 %v3565_v33  ;;  %3288 = vmatprep.subr.bf16.mxu1 %v3566_v38 }
 0x20d   : > { %1022 = vst [vmem:[#allocation2 + $0x20] sm:$0x1f] %v1021_v56  ;;  %v834_v61 = vpop.f32.mrb[12].mxu1  ;;  %v1137_v62 = vshrl.u32 %v3053_v51, 16  ;;  %v1140_v63 = vshll.u32 %v3053_v51, 16  ;;  %v1146_v0 = vshll.u32 %v3054_v52, 16  ;;  %v3123_v3 = vcombine.low %v4015_v53, %v4015_v53  ;;  %1394 = vrot.lane.b32.xlu0 %v3483_v60, %s3640_s24 }
 0x20e   : > { %v1735_v1 = vld [vmem:[#allocation2 + $0x10] sm:$0x1f]  ;;  %v974_v4 = vrot.slane %v972_v57, 7  ;;  %v979_v5 = vshrl.u32 %v3271_v59, 16  ;;  %v982_v6 = vshll.u32 %v3271_v59, 16  ;;  %v835_v7 = vadd.f32 %v3938_v17, %v834_v61  ;;  %v836_v8 = vpop.f32.mrb[13].mxu1 }
 0x20f   : > { %v837_v10 = vpop.f32.mrb[14].mxu1  ;;  %v1139_v11 = vrot.slane %v1137_v62, 4  ;;  %v1142_v12 = vrot.slane %v1140_v63, 5  ;;  %v1148_v13 = vrot.slane %v1146_v0, 5  ;;  %v3155_v14 = vcombine.low %v1735_v1, %v1735_v1  ;;  %v3562_v31 = vld [vmem:[#allocation2] ss:$8 sps:$4 sm:$0xff]  }
 0x210   : > { %v977_v15 = vor.u32 %v975_v58, %v974_v4  ;;  %v981_v16 = vrot.slane %v979_v5, 7  ;;  %v847_v19 = vmax.f32 %v835_v7, 0.0  ;;  %v838_v21 = vadd.f32 %v3938_v17, %v837_v10  ;;  %v839_v22 = vpop.f32.mrb[15].mxu1  ;;  %1067 = vst.msk [vmem:[#allocation3] sm:$0xff] %vm853_vm7, %v3562_v31  ;;  %v1073_v58 = vld [vmem:[#allocation2 + $0x10] sm:$0x1f] }
 0x211   : > { %v1143_v26 = vor.u32 %v1142_v12, %v1139_v11  ;;  %v3156_v27 = vcombine.high %v1735_v1, %v1735_v1  ;;  %v1784_v28 = vshrl.u32 %v3155_v14, 16  ;;  %v1787_v29 = vshll.u32 %v3155_v14, 16  ;;  %v3567_v59 = vld [vmem:[%s4446_s4 + $0x38] sm:$0xff]   ;;  %v3568_v1 = vld [vmem:[%s4446_s4 + $0xe0] sm:$0xff]   ;;  %v1591_v33 = vld [vmem:[#allocation2 + $0x10] sm:$0x1e] }
 0x212   : > { %v1024_v17 = vsel %vm3946_vm10, %v977_v15, %v1023_v9  ;;  %v984_v34 = vor.u32 %v982_v6, %v981_v16  ;;  %v3272_v35 = vpack.c.bf16 %v847_v19, %v847_v19  ;;  %v848_v36 = vmax.f32 %v838_v21, 0.0  ;;  %v1736_v37 = vld [vmem:[#allocation2 + $0x18] sm:$0x1f]  ;;  %3289 = vmatpush3.bf16.msra.mxu1 %v3567_v59  ;;  %v3569_v9 = vld [vmem:[%s4446_s4 + $0xa0] sm:$0xff]   ;;  %3322 = vmatprep.subr.bf16.mxu0 %v3568_v1 }
 0x213   : > { %1025 = vst [vmem:[#allocation2 + $0x28] sm:$0x1f] %v1024_v17  ;;  %v1144_v39 = vrot.slane %v1143_v26, 4  ;;  %v3157_v40 = vcombine.low %v1736_v37, %v1736_v37  ;;  %v3158_v41 = vcombine.high %v1736_v37, %v1736_v37  ;;  %v1786_v44 = vrot.slane %v1784_v28, 4  ;;  %v1074_v0 = vld [vmem:[#allocation2 + $0x18] sm:$0x1f]  ;;  %3323 = vmatpush3.bf16.msra.mxu0 %v3569_v9 }
 0x214   : > { %v1027_v45 = vsel %vm3946_vm10, %v984_v34, %v1026_v18  ;;  %v986_v46 = vshrl.u32 %v3272_v35, 16  ;;  %v989_v47 = vshll.u32 %v3272_v35, 16  ;;  %v3273_v48 = vpack.c.bf16 %v848_v36, %v848_v36  ;;  %v3484_v50 = vld [vmem:[#allocation2 + $0x18] ss:$8 sps:$4 sm:$0xff]   ;;  %v3574_v37 = vld [vmem:[%s4446_s4 + $0xa8] sm:$0xff]  }
 0x215   : > { %1028 = vst [vmem:[#allocation2 + $0x30] sm:$0x1f] %v1027_v45  ;;  %v1149_v51 = vsel %vm3982_vm15, %v1144_v39, %v1148_v13  ;;  %v1789_v52 = vrot.slane %v1787_v29, 5  ;;  %v1793_v56 = vshll.u32 %v3156_v27, 16  ;;  %v1798_v57 = vshrl.u32 %v3157_v40, 16  ;;  %1396 = vrot.lane.b32.xlu1 %v3484_v50, %s3640_s24  ;;  %v4062_v14 = vld [vmem:[%s4446_s4 + $0x100] sm:$0xff]  }
 0x216   : > { %v988_v60 = vrot.slane %v986_v46, 7  ;;  %v993_v61 = vshrl.u32 %v3273_v48, 16  ;;  %v996_v62 = vshll.u32 %v3273_v48, 16  ;;  %v3067_v63 = vcombine.low %v4000_v2, %v1149_v51  ;;  %v1029_v4 = vld [vmem:[#allocation2 + $0x38] sm:$0x1f]  ;;  %3370 = vmatprep.subr.bf16.mxu1 %v4062_v14  ;;  %v3573_v27 = vld [vmem:[%s4446_s4 + $0xe8] sm:$0xff]  }
 0x217   : > { %v1790_v5 = vor.u32 %v1789_v52, %v1786_v44  ;;  %v1795_v6 = vrot.slane %v1793_v56, 5  ;;  %v1800_v7 = vrot.slane %v1798_v57, 4  ;;  %v1801_v8 = vshll.u32 %v3157_v40, 16  ;;  %v1032_v12 = vld [vmem:[#allocation2 + $0x40] sm:$0x1f]  ;;  %3324 = vmatprep.subr.bf16.mxu0 %v3573_v27  ;;  %v3583_v48 = vld [vmem:[%s4446_s4 + $0xf0] sm:$0xff]  }
 0x218   : > { %v991_v10 = vor.u32 %v989_v47, %v988_v60  ;;  %v995_v11 = vrot.slane %v993_v61, 7  ;;  %1246 = vrot.lane.b32.xlu0 %v3067_v63, %s3640_s24  ;;  %v1807_v2 = vshll.u32 %v3158_v41, 16  ;;  %v3055_v13 = vcombine.low %v1073_v58, %v1073_v58  ;;  %v1737_v47 = vld [vmem:[#allocation2 + $0x20] sm:$0x1f]  ;;  %3325 = vmatpush3.bf16.msra.mxu0 %v3574_v37  ;;  %v3571_v63 = vld [vmem:[#allocation2 + $0x10] ss:$8 sps:$4 sm:$0xff]  }
 0x219   : > { %v1791_v15 = vrot.slane %v1790_v5, 4  ;;  %v1803_v16 = vrot.slane %v1801_v8, 5  ;;  %v3056_v18 = vcombine.high %v1073_v58, %v1073_v58  ;;  %v3057_v19 = vcombine.low %v1074_v0, %v1074_v0  ;;  %v3584_v58 = vld [vmem:[%s4446_s4 + $0xb0] sm:$0xff]   ;;  %3326 = vmatprep.subr.bf16.mxu0 %v3583_v48  ;;  %1731 = vst.msk [vmem:[#allocation3 + $0x18] sm:$0xff] %vm853_vm7, %v3571_v63 }
 0x21a   : > { %v1030_v21 = vsel %vm3946_vm10, %v991_v10, %v1029_v4  ;;  %v998_v22 = vor.u32 %v996_v62, %v995_v11  ;;  %v1809_v25 = vrot.slane %v1807_v2, 5  ;;  %v3058_v26 = vcombine.high %v1074_v0, %v1074_v0  ;;  %v1738_v57 = vld [vmem:[#allocation2 + $0x28] sm:$0x1f] }
 0x21b   : > { %1031 = vst [vmem:[#allocation2 + $0x38] sm:$0x1f] %v1030_v21  ;;  %v1796_v28 = vsel %vm3982_vm15, %v1791_v15, %v1795_v6  ;;  %v1804_v29 = vor.u32 %v1803_v16, %v1800_v7  ;;  %v1151_v31 = vshrl.u32 %v3055_v13, 16  ;;  %v1154_v32 = vshll.u32 %v3055_v13, 16  ;;  %v1076_v2 = vld [vmem:[#allocation2 + $0x28] sm:$0x1f] }
 0x21c   : > { %v1033_v17 = vsel %vm3946_vm10, %v998_v22, %v1032_v12  ;;  %v1160_v34 = vshll.u32 %v3056_v18, 16  ;;  %v1165_v35 = vshrl.u32 %v3057_v19, 16  ;;  %v1168_v36 = vshll.u32 %v3057_v19, 16  ;;  %3327 = vmatpush3.bf16.msra.mxu0 %v3584_v58  ;;  %v1075_v12 = vld [vmem:[#allocation2 + $0x20] sm:$0x1f] }
 0x21d   : > { %1034 = vst [vmem:[#allocation2 + $0x40] sm:$0x1f] %v1033_v17  ;;  %v1805_v38 = vrot.slane %v1804_v29, 4  ;;  %v1153_v39 = vrot.slane %v1151_v31, 4  ;;  %v1156_v40 = vrot.slane %v1154_v32, 5  ;;  %v1174_v41 = vshll.u32 %v3058_v26, 16 }
 0x21e   : > { %v1162_v44 = vrot.slane %v1160_v34, 5  ;;  %v1167_v45 = vrot.slane %v1165_v35, 4  ;;  %v1170_v46 = vrot.slane %v1168_v36, 5  ;;  %v3124_v49 = vcombine.high %v4015_v53, %v4015_v53  ;;  %v3501_v16 = vld [vmem:[#allocation2 + $0x28] ss:$8 sps:$4 sm:$0xff]  }
 0x21f   : > { %v1810_v50 = vsel %vm3982_vm15, %v1805_v38, %v1809_v25  ;;  %v1157_v51 = vor.u32 %v1156_v40, %v1153_v39  ;;  %v1176_v52 = vrot.slane %v1174_v41, 5  ;;  %v3125_v56 = vcombine.low %v1591_v33, %v1591_v33  ;;  %v3572_v32 = vld [vmem:[#allocation2 + $0x10] ss:$8 sps:$4 sm:$0xff]   ;;  %v1593_v41 = vld [vmem:[#allocation2 + $0x20] sm:$0x1e] }
 0x220   : > { %v3171_v59 = vcombine.low %v1796_v28, %v1810_v50  ;;  %v1171_v60 = vor.u32 %v1170_v46, %v1167_v45  ;;  %v3126_v61 = vcombine.high %v1591_v33, %v1591_v33  ;;  %v3139_v62 = vrot.slane %v3123_v3, 9  ;;  %v1592_v40 = vld [vmem:[#allocation2 + $0x18] sm:$0x1e]  ;;  %1068 = vst.msk [vmem:[#allocation3 + $0x28] sm:$0xff] %vm853_vm7, %v3572_v32  ;;  %v1268_v24 = vld [vmem:[#allocation2 + $0x28] sm:$0x1e] }
 0x221   : > { %v1158_v0 = vrot.slane %v1157_v51, 4  ;;  %v1640_v1 = vrot.slane %v3124_v49, 5  ;;  %v3140_v4 = vrot.slane %v3125_v56, 9  ;;  %v3159_v5 = vcombine.low %v1737_v47, %v1737_v47 }
 0x222   : > { %1907 = vrot.lane.b32.xlu0 %v3171_v59, %s3640_s24  ;;  %v1172_v6 = vrot.slane %v1171_v60, 4  ;;  %v1644_v7 = vrot.slane %v3126_v61, 5  ;;  %v3160_v8 = vcombine.high %v1737_v47, %v1737_v47  ;;  %v3161_v9 = vcombine.low %v1738_v57, %v1738_v57  ;;  %v1739_v47 = vld [vmem:[#allocation2 + $0x30] sm:$0x1f]  ;;  %v3585_v60 = vld [vmem:[#allocation2 + $0x20] ss:$8 sps:$4 sm:$0xff]  }
 0x223   : > { %v1163_v10 = vsel %vm3982_vm15, %v1158_v0, %v1162_v44  ;;  %v1641_v53 = vsel %vm3993_vm0, %v3139_v62, %v1640_v1  ;;  %v3162_v3 = vcombine.high %v1738_v57, %v1738_v57  ;;  %v1812_v11 = vshrl.u32 %v3159_v5, 16  ;;  %v3588_v1 = vld [vmem:[%s4446_s4 + $0xf8] sm:$0xff]   ;;  %1732 = vst.msk [vmem:[#allocation3 + $0x40] sm:$0xff] %vm853_vm7, %v3585_v60 }
 0x224   : > { %v1177_v13 = vsel %vm3982_vm15, %v1172_v6, %v1176_v52  ;;  %v1645_v15 = vsel %vm3993_vm0, %v3140_v4, %v1644_v7  ;;  %v1815_v18 = vshll.u32 %v3159_v5, 16  ;;  %v1821_v19 = vshll.u32 %v3160_v8, 16  ;;  %v3586_v8 = vld [vmem:[#allocation2 + $0x20] ss:$8 sps:$4 sm:$0xff]   ;;  %3328 = vmatprep.subr.bf16.mxu0 %v3588_v1  ;;  %v1078_v32 = vld [vmem:[#allocation2 + $0x38] sm:$0x1f] }
 0x225   : > { %v3068_v21 = vcombine.low %v1163_v10, %v1177_v13  ;;  %v3147_v22 = vcombine.low %v1641_v53, %v1645_v15  ;;  %v1814_v25 = vrot.slane %v1812_v11, 4  ;;  %v1826_v26 = vshrl.u32 %v3161_v9, 16  ;;  %v1740_v11 = vld [vmem:[#allocation2 + $0x38] sm:$0x1f]  ;;  %1069 = vst.msk [vmem:[#allocation3 + $0x50] sm:$0xff] %vm853_vm7, %v3586_v8 }
 0x226   : > { %1398 = vrot.lane.b32.xlu0 %v3501_v16, %s3640_s24  ;;  %v1817_v27 = vrot.slane %v1815_v18, 5  ;;  %v1823_v28 = vrot.slane %v1821_v19, 5  ;;  %v1829_v29 = vshll.u32 %v3161_v9, 16  ;;  %v1835_v31 = vshll.u32 %v3162_v3, 16  ;;  %v3589_v9 = vld [vmem:[%s4446_s4 + $0xb8] sm:$0xff]  }
 0x227   : > { %1248 = vrot.lane.b32.xlu1 %v3068_v21, %s3640_s24  ;;  %v1828_v33 = vrot.slane %v1826_v26, 4  ;;  %v3059_v17 = vcombine.low %v1075_v12, %v1075_v12  ;;  %v3060_v34 = vcombine.high %v1075_v12, %v1075_v12  ;;  %v3061_v35 = vcombine.low %v1076_v2, %v1076_v2  ;;  %3329 = vmatpush3.bf16.msra.mxu0 %v3589_v9 }
 0x228   : > { %v1818_v36 = vor.u32 %v1817_v27, %v1814_v25  ;;  %v1831_v37 = vrot.slane %v1829_v29, 5  ;;  %v1837_v38 = vrot.slane %v1835_v31, 5  ;;  %v3062_v39 = vcombine.high %v1076_v2, %v1076_v2  ;;  %v1077_v25 = vld [vmem:[#allocation2 + $0x30] sm:$0x1f] }
 0x229   : > { %v1179_v44 = vshrl.u32 %v3059_v17, 16  ;;  %v1182_v45 = vshll.u32 %v3059_v17, 16  ;;  %v1188_v46 = vshll.u32 %v3060_v34, 16  ;;  %v1193_v49 = vshrl.u32 %v3061_v35, 16 }
 0x22a   : > { %v1819_v48 = vrot.slane %v1818_v36, 4  ;;  %v1832_v50 = vor.u32 %v1831_v37, %v1828_v33  ;;  %v1196_v51 = vshll.u32 %v3061_v35, 16  ;;  %v1202_v52 = vshll.u32 %v3062_v39, 16  ;;  %v3599_v33 = vld [vmem:[#allocation2 + $0x30] ss:$8 sps:$4 sm:$0xff]  }
 0x22b   : > { %1682 = vrot.lane.b32.xlu1 %v3147_v22, %s3640_s24  ;;  %v1181_v56 = vrot.slane %v1179_v44, 4  ;;  %v1184_v57 = vrot.slane %v1182_v45, 5  ;;  %v1190_v58 = vrot.slane %v1188_v46, 5  ;;  %v1195_v59 = vrot.slane %v1193_v49, 4  ;;  %v3600_v37 = vld [vmem:[#allocation2 + $0x30] ss:$8 sps:$4 sm:$0xff]  }
 0x22c   : > { %v1824_v61 = vsel %vm3982_vm15, %v1819_v48, %v1823_v28  ;;  %v1833_v62 = vrot.slane %v1832_v50, 4  ;;  %v1198_v63 = vrot.slane %v1196_v51, 5  ;;  %v1204_v0 = vrot.slane %v1202_v52, 5  ;;  %v3514_v28 = vld [vmem:[#allocation2 + $0x38] ss:$8 sps:$4 sm:$0xff]   ;;  %1733 = vst.msk [vmem:[#allocation3 + $0x68] sm:$0xff] %vm853_vm7, %v3599_v33 }
 0x22d   : > { %v1185_v4 = vor.u32 %v1184_v57, %v1181_v56  ;;  %v3127_v5 = vcombine.low %v1592_v40, %v1592_v40  ;;  %v3128_v6 = vcombine.high %v1592_v40, %v1592_v40  ;;  %v3129_v7 = vcombine.low %v1593_v41, %v1593_v41  ;;  %v3601_v44 = vld [vmem:[#allocation2 + $0x40] ss:$8 sps:$4 sm:$0xff]   ;;  %1070 = vst.msk [vmem:[#allocation3 + $0x78] sm:$0xff] %vm853_vm7, %v3600_v37 }
 0x22e   : > { %v1838_v10 = vsel %vm3982_vm15, %v1833_v62, %v1837_v38  ;;  %v1199_v53 = vor.u32 %v1198_v63, %v1195_v59  ;;  %v3130_v3 = vcombine.high %v1593_v41, %v1593_v41  ;;  %v3163_v12 = vcombine.low %v1739_v47, %v1739_v47  ;;  %1734 = vst.msk [vmem:[#allocation3 + $0x90] sm:$0xff] %vm853_vm7, %v3601_v44 }
 0x22f   : > { %v3172_v2 = vcombine.low %v1824_v61, %v1838_v10  ;;  %v1186_v13 = vrot.slane %v1185_v4, 4  ;;  %v3141_v15 = vrot.slane %v3127_v5, 9  ;;  %v1648_v16 = vrot.slane %v3128_v6, 5  ;;  %v1741_v6 = vld [vmem:[#allocation2 + $0x40] sm:$0x1f] }
 0x230   : > { %v1200_v18 = vrot.slane %v1199_v53, 4  ;;  %v3142_v19 = vrot.slane %v3129_v7, 9  ;;  %v1652_v21 = vrot.slane %v3130_v3, 5  ;;  %v3164_v22 = vcombine.high %v1739_v47, %v1739_v47  ;;  %v1594_v53 = vld [vmem:[#allocation2 + $0x28] sm:$0x1e] }
 0x231   : > { %1909 = vrot.lane.b32.xlu0 %v3172_v2, %s3640_s24  ;;  %v1191_v26 = vsel %vm3982_vm15, %v1186_v13, %v1190_v58  ;;  %v1649_v27 = vsel %vm3993_vm0, %v3141_v15, %v1648_v16  ;;  %v3165_v29 = vcombine.low %v1740_v11, %v1740_v11  ;;  %v3166_v31 = vcombine.high %v1740_v11, %v1740_v11 }
 0x232   : > { %v1205_v17 = vsel %vm3982_vm15, %v1200_v18, %v1204_v0  ;;  %v1653_v34 = vsel %vm3993_vm0, %v3142_v19, %v1652_v21  ;;  %v1840_v35 = vshrl.u32 %v3163_v12, 16  ;;  %v1843_v36 = vshll.u32 %v3163_v12, 16  ;;  %v1595_v19 = vld [vmem:[#allocation2 + $0x30] sm:$0x1e] }
 0x233   : > { %v3069_v38 = vcombine.low %v1191_v26, %v1205_v17  ;;  %v3148_v39 = vcombine.low %v1649_v27, %v1653_v34  ;;  %v1849_v40 = vshll.u32 %v3164_v22, 16  ;;  %v1854_v41 = vshrl.u32 %v3165_v29, 16 }
 0x234   : > { %v1842_v45 = vrot.slane %v1840_v35, 4  ;;  %v1845_v46 = vrot.slane %v1843_v36, 5  ;;  %v1857_v49 = vshll.u32 %v3165_v29, 16  ;;  %v1863_v47 = vshll.u32 %v3166_v31, 16  ;;  %v1596_v35 = vld [vmem:[#allocation2 + $0x38] sm:$0x1e] }
 0x235   : > { %1250 = vrot.lane.b32.xlu1 %v3069_v38, %s3640_s24  ;;  %1400 = vrot.lane.b32.xlu0 %v3514_v28, %s3640_s24  ;;  %v1851_v48 = vrot.slane %v1849_v40, 5  ;;  %v1856_v50 = vrot.slane %v1854_v41, 4  ;;  %v3063_v51 = vcombine.low %v1077_v25, %v1077_v25  ;;  %v3064_v52 = vcombine.high %v1077_v25, %v1077_v25  ;;  %v1597_v40 = vld [vmem:[#allocation2 + $0x40] sm:$0x1e] }
 0x236   : > { %v1846_v56 = vor.u32 %v1845_v46, %v1842_v45  ;;  %v1859_v57 = vrot.slane %v1857_v49, 5  ;;  %v1865_v58 = vrot.slane %v1863_v47, 5  ;;  %v3065_v59 = vcombine.low %v1078_v32, %v1078_v32  ;;  %v1264_v49 = vld [vmem:[#allocation2 + $0x8] sm:$0x1e] }
 0x237   : > { %v3066_v60 = vcombine.high %v1078_v32, %v1078_v32  ;;  %v1207_v61 = vshrl.u32 %v3063_v51, 16  ;;  %v1210_v62 = vshll.u32 %v3063_v51, 16  ;;  %v1216_v63 = vshll.u32 %v3064_v52, 16 }
 0x238   : > { %v1847_v0 = vrot.slane %v1846_v56, 4  ;;  %v1860_v1 = vor.u32 %v1859_v57, %v1856_v50  ;;  %v1221_v4 = vshrl.u32 %v3065_v59, 16  ;;  %v1224_v5 = vshll.u32 %v3065_v59, 16  ;;  %v1265_v59 = vld [vmem:[#allocation2 + $0x10] sm:$0x1e] }
 0x239   : > { %1684 = vrot.lane.b32.xlu1 %v3148_v39, %s3640_s24  ;;  %v1209_v7 = vrot.slane %v1207_v61, 4  ;;  %v1212_v8 = vrot.slane %v1210_v62, 5  ;;  %v1218_v9 = vrot.slane %v1216_v63, 5  ;;  %v1230_v10 = vshll.u32 %v3066_v60, 16 }
 0x23a   : > { %v1852_v3 = vsel %vm3982_vm15, %v1847_v0, %v1851_v48  ;;  %v1861_v11 = vrot.slane %v1860_v1, 4  ;;  %v1223_v12 = vrot.slane %v1221_v4, 4  ;;  %v1226_v2 = vrot.slane %v1224_v5, 5 }
 0x23b   : > { %v1213_v13 = vor.u32 %v1212_v8, %v1209_v7  ;;  %v1232_v15 = vrot.slane %v1230_v10, 5  ;;  %v3167_v16 = vcombine.low %v1741_v6, %v1741_v6  ;;  %v3168_v18 = vcombine.high %v1741_v6, %v1741_v6  ;;  %v1266_v6 = vld [vmem:[#allocation2 + $0x18] sm:$0x1e] }
 0x23c   : > { %v1866_v21 = vsel %vm3982_vm15, %v1861_v11, %v1865_v58  ;;  %v1227_v22 = vor.u32 %v1226_v2, %v1223_v12  ;;  %v3131_v25 = vcombine.low %v1594_v53, %v1594_v53  ;;  %v3132_v26 = vcombine.high %v1594_v53, %v1594_v53  ;;  %v1410_v53 = vld [vmem:[#allocation2 + $0x8] sm:$0x1f] }
 0x23d   : > { %v3173_v27 = vcombine.low %v1852_v3, %v1866_v21  ;;  %v1214_v28 = vrot.slane %v1213_v13, 4  ;;  %v1868_v29 = vshrl.u32 %v3167_v16, 16  ;;  %v1871_v31 = vshll.u32 %v3167_v16, 16  ;;  %v1411_v13 = vld [vmem:[#allocation2 + $0x10] sm:$0x1f] }
 0x23e   : > { %v1228_v32 = vrot.slane %v1227_v22, 4  ;;  %v1877_v33 = vshll.u32 %v3168_v18, 16  ;;  %v3133_v17 = vcombine.low %v1595_v19, %v1595_v19  ;;  %v3134_v34 = vcombine.high %v1595_v19, %v1595_v19 }
 0x23f   : > { %1911 = vrot.lane.b32.xlu0 %v3173_v27, %s3640_s24  ;;  %v1219_v36 = vsel %vm3982_vm15, %v1214_v28, %v1218_v9  ;;  %v1870_v37 = vrot.slane %v1868_v29, 4  ;;  %v1873_v38 = vrot.slane %v1871_v31, 5  ;;  %v3143_v39 = vrot.slane %v3131_v25, 9  ;;  %v1267_v31 = vld [vmem:[#allocation2 + $0x20] sm:$0x1e] }
 0x240   : > { %v1233_v41 = vsel %vm3982_vm15, %v1228_v32, %v1232_v15  ;;  %v1879_v44 = vrot.slane %v1877_v33, 5  ;;  %v1656_v45 = vrot.slane %v3132_v26, 5  ;;  %v3144_v46 = vrot.slane %v3133_v17, 9 }
 0x241   : > { %v3070_v47 = vcombine.low %v1219_v36, %v1233_v41  ;;  %v1874_v48 = vor.u32 %v1873_v38, %v1870_v37  ;;  %v1660_v50 = vrot.slane %v3134_v34, 5  ;;  %v3135_v51 = vcombine.low %v1596_v35, %v1596_v35 }
 0x242   : > { %v1657_v52 = vsel %vm3993_vm0, %v3143_v39, %v1656_v45  ;;  %v3136_v56 = vcombine.high %v1596_v35, %v1596_v35  ;;  %v3137_v57 = vcombine.low %v1597_v40, %v1597_v40  ;;  %v3138_v58 = vcombine.high %v1597_v40, %v1597_v40 }
 0x243   : > { %1252 = vrot.lane.b32.xlu1 %v3070_v47, %s3640_s24  ;;  %v1875_v60 = vrot.slane %v1874_v48, 4  ;;  %v1661_v61 = vsel %vm3993_vm0, %v3144_v46, %v1660_v50  ;;  %v3145_v62 = vrot.slane %v3135_v51, 9  ;;  %v3073_v63 = vcombine.low %v1264_v49, %v1264_v49  ;;  %v1413_v47 = vld [vmem:[#allocation2 + $0x20] sm:$0x1f] }
 0x244   : > { %v3149_v0 = vcombine.low %v1657_v52, %v1661_v61  ;;  %v1664_v1 = vrot.slane %v3136_v56, 5  ;;  %v3146_v4 = vrot.slane %v3137_v57, 9  ;;  %v1668_v5 = vrot.slane %v3138_v58, 5 }
 0x245   : > { %v1880_v7 = vsel %vm3982_vm15, %v1875_v60, %v1879_v44  ;;  %v3074_v8 = vcombine.high %v1264_v49, %v1264_v49  ;;  %v3088_v9 = vrot.slane %v3073_v63, 9  ;;  %v3075_v10 = vcombine.low %v1265_v59, %v1265_v59 }
 0x246   : > { %v3174_v3 = vcombine.low %v1880_v7, %v4004_v42  ;;  %v1665_v11 = vsel %vm3993_vm0, %v3145_v62, %v1664_v1  ;;  %v1669_v12 = vsel %vm3993_vm0, %v3146_v4, %v1668_v5  ;;  %v3076_v2 = vcombine.high %v1265_v59, %v1265_v59 }
 0x247   : > { %1686 = vrot.lane.b32.xlu1 %v3149_v0, %s3640_s24  ;;  %v3150_v15 = vcombine.low %v1665_v11, %v1669_v12  ;;  %v1320_v16 = vrot.slane %v3074_v8, 5  ;;  %v3089_v18 = vrot.slane %v3075_v10, 9  ;;  %v3077_v19 = vcombine.low %v1266_v6, %v1266_v6  ;;  %v1269_v12 = vld [vmem:[#allocation2 + $0x30] sm:$0x1e] }
 0x248   : > { %1913 = vrot.lane.b32.xlu0 %v3174_v3, %s3640_s24  ;;  %v1324_v21 = vrot.slane %v3076_v2, 5  ;;  %v3078_v22 = vcombine.high %v1266_v6, %v1266_v6  ;;  %v3103_v25 = vcombine.low %v1410_v53, %v1410_v53  ;;  %v3104_v42 = vcombine.high %v1410_v53, %v1410_v53 }
 0x249   : > { %v1321_v26 = vsel %vm3993_vm0, %v3088_v9, %v1320_v16  ;;  %v3090_v27 = vrot.slane %v3077_v19, 9  ;;  %v3105_v28 = vcombine.low %v1411_v13, %v1411_v13  ;;  %v3106_v29 = vcombine.high %v1411_v13, %v1411_v13  ;;  %v1414_v19 = vld [vmem:[#allocation2 + $0x28] sm:$0x1f] }
 0x24a   : > { %v3095_v32 = vcombine.low %v1317_v43, %v1321_v26  ;;  %v1325_v33 = vsel %vm3993_vm0, %v3089_v18, %v1324_v21  ;;  %v1328_v17 = vrot.slane %v3078_v22, 5  ;;  %v1459_v34 = vshrl.u32 %v3103_v25, 16  ;;  %v1412_v43 = vld [vmem:[#allocation2 + $0x18] sm:$0x1f] }
 0x24b   : > { %1688 = vrot.lane.b32.xlu1 %v3150_v15, %s3640_s24  ;;  %v1462_v35 = vshll.u32 %v3103_v25, 16  ;;  %v1468_v36 = vshll.u32 %v3104_v42, 16  ;;  %v1473_v37 = vshrl.u32 %v3105_v28, 16  ;;  %v1476_v38 = vshll.u32 %v3105_v28, 16  ;;  %v1270_v18 = vld [vmem:[#allocation2 + $0x38] sm:$0x1e] }
 0x24c   : > { %1362 = vst.msk [vmem:[#allocation3 + $0x8] sm:$0xff] %vm853_vm7, %v3095_v32  ;;  %v1329_v39 = vsel %vm3993_vm0, %v3090_v27, %v1328_v17  ;;  %v1461_v40 = vrot.slane %v1459_v34, 4  ;;  %v1482_v41 = vshll.u32 %v3106_v29, 16  ;;  %v3079_v23 = vcombine.low %v1267_v31, %v1267_v31  ;;  %v1415_v17 = vld [vmem:[#allocation2 + $0x30] sm:$0x1f] }
 0x24d   : > { %v3096_v44 = vcombine.low %v1325_v33, %v1329_v39  ;;  %v1464_v45 = vrot.slane %v1462_v35, 5  ;;  %v1470_v46 = vrot.slane %v1468_v36, 5  ;;  %v1475_v49 = vrot.slane %v1473_v37, 4 }
 0x24e   : > { %v1478_v48 = vrot.slane %v1476_v38, 5  ;;  %v1484_v50 = vrot.slane %v1482_v41, 5  ;;  %v3080_v51 = vcombine.high %v1267_v31, %v1267_v31  ;;  %v3091_v52 = vrot.slane %v3079_v23, 9 }
 0x24f   : > { %1363 = vst.msk [vmem:[#allocation3 + $0x30] sm:$0xff] %vm853_vm7, %v3096_v44  ;;  %v1465_v56 = vor.u32 %v1464_v45, %v1461_v40  ;;  %v3081_v57 = vcombine.low %v1268_v24, %v1268_v24  ;;  %v3082_v58 = vcombine.high %v1268_v24, %v1268_v24  ;;  %v3107_v59 = vcombine.low %v1412_v43, %v1412_v43 }
 0x250   : > { %v1479_v60 = vor.u32 %v1478_v48, %v1475_v49  ;;  %v1332_v61 = vrot.slane %v3080_v51, 5  ;;  %v3108_v62 = vcombine.high %v1412_v43, %v1412_v43  ;;  %v3109_v63 = vcombine.low %v1413_v47, %v1413_v47 }
 0x251   : > { %v1466_v0 = vrot.slane %v1465_v56, 4  ;;  %v3092_v1 = vrot.slane %v3081_v57, 9  ;;  %v1336_v4 = vrot.slane %v3082_v58, 5  ;;  %v3110_v5 = vcombine.high %v1413_v47, %v1413_v47  ;;  %v1417_v58 = vld [vmem:[#allocation2 + $0x40] sm:$0x1f] }
 0x252   : > { %v1480_v6 = vrot.slane %v1479_v60, 4  ;;  %v1333_v7 = vsel %vm3993_vm0, %v3091_v52, %v1332_v61  ;;  %v1487_v8 = vshrl.u32 %v3107_v59, 16  ;;  %v1490_v9 = vshll.u32 %v3107_v59, 16 }
 0x253   : > { %v1471_v10 = vsel %vm3982_vm15, %v1466_v0, %v1470_v46  ;;  %v1337_v53 = vsel %vm3993_vm0, %v3092_v1, %v1336_v4  ;;  %v1496_v3 = vshll.u32 %v3108_v62, 16  ;;  %v1501_v11 = vshrl.u32 %v3109_v63, 16 }
 0x254   : > { %v1485_v2 = vsel %vm3982_vm15, %v1480_v6, %v1484_v50  ;;  %v3097_v13 = vcombine.low %v1333_v7, %v1337_v53  ;;  %v1489_v15 = vrot.slane %v1487_v8, 4  ;;  %v1492_v16 = vrot.slane %v1490_v9, 5  ;;  %v1416_v50 = vld [vmem:[#allocation2 + $0x38] sm:$0x1f] }
 0x255   : > { %v3119_v21 = vcombine.low %v1471_v10, %v1485_v2  ;;  %v1498_v22 = vrot.slane %v1496_v3, 5  ;;  %v1503_v25 = vrot.slane %v1501_v11, 4  ;;  %v1504_v42 = vshll.u32 %v3109_v63, 16  ;;  %v1923_v63 = vld [vmem:[#allocation2 + $0x10] sm:$0x1e] }
 0x256   : > { %1364 = vst.msk [vmem:[#allocation3 + $0x58] sm:$0xff] %vm853_vm7, %v3097_v13  ;;  %v1493_v26 = vor.u32 %v1492_v16, %v1489_v15  ;;  %v1510_v27 = vshll.u32 %v3110_v5, 16  ;;  %v3083_v28 = vcombine.low %v1269_v12, %v1269_v12  ;;  %v3084_v29 = vcombine.high %v1269_v12, %v1269_v12 }
 0x257   : > { %1586 = vst.msk [vmem:[#allocation3 + $0x10] sm:$0xff] %vm853_vm7, %v3119_v21  ;;  %v1506_v31 = vrot.slane %v1504_v42, 5  ;;  %v3085_v32 = vcombine.low %v1270_v18, %v1270_v18  ;;  %v3086_v33 = vcombine.high %v1270_v18, %v1270_v18  ;;  %v3111_v34 = vcombine.low %v1414_v19, %v1414_v19 }
 0x258   : > { %v1494_v35 = vrot.slane %v1493_v26, 4  ;;  %v1512_v36 = vrot.slane %v1510_v27, 5  ;;  %v3093_v37 = vrot.slane %v3083_v28, 9  ;;  %v1340_v38 = vrot.slane %v3084_v29, 5  ;;  %v1925_v28 = vld [vmem:[#allocation2 + $0x20] sm:$0x1e] }
 0x259   : > { %v1507_v39 = vor.u32 %v1506_v31, %v1503_v25  ;;  %v3094_v40 = vrot.slane %v3085_v32, 9  ;;  %v1344_v41 = vrot.slane %v3086_v33, 5  ;;  %v3112_v23 = vcombine.high %v1414_v19, %v1414_v19 }
 0x25a   : > { %v1499_v24 = vsel %vm3982_vm15, %v1494_v35, %v1498_v22  ;;  %v1341_v43 = vsel %vm3993_vm0, %v3093_v37, %v1340_v38  ;;  %v3113_v44 = vcombine.low %v1415_v17, %v1415_v17  ;;  %v3114_v45 = vcombine.high %v1415_v17, %v1415_v17  ;;  %v1924_v22 = vld [vmem:[#allocation2 + $0x18] sm:$0x1e]  ;;  %v1926_v37 = vld [vmem:[#allocation2 + $0x28] sm:$0x1e] }
 0x25b   : > { %v1508_v46 = vrot.slane %v1507_v39, 4  ;;  %v1345_v49 = vsel %vm3993_vm0, %v3094_v40, %v1344_v41  ;;  %v1515_v47 = vshrl.u32 %v3111_v34, 16  ;;  %v1518_v48 = vshll.u32 %v3111_v34, 16 }
 0x25c   : > { %v3098_v51 = vcombine.low %v1341_v43, %v1345_v49  ;;  %v1524_v52 = vshll.u32 %v3112_v23, 16  ;;  %v1529_v56 = vshrl.u32 %v3113_v44, 16  ;;  %v1532_v57 = vshll.u32 %v3113_v44, 16 }
 0x25d   : > { %v1513_v59 = vsel %vm3982_vm15, %v1508_v46, %v1512_v36  ;;  %v1517_v60 = vrot.slane %v1515_v47, 4  ;;  %v1520_v61 = vrot.slane %v1518_v48, 5  ;;  %v1538_v62 = vshll.u32 %v3114_v45, 16  ;;  %v1927_v48 = vld [vmem:[#allocation2 + $0x30] sm:$0x1e] }
 0x25e   : > { %v3120_v0 = vcombine.low %v1499_v24, %v1513_v59  ;;  %1365 = vst.msk [vmem:[#allocation3 + $0x80] sm:$0xff] %vm853_vm7, %v3098_v51  ;;  %v1526_v1 = vrot.slane %v1524_v52, 5  ;;  %v1531_v4 = vrot.slane %v1529_v56, 4  ;;  %v1534_v5 = vrot.slane %v1532_v57, 5  ;;  %v1928_v57 = vld [vmem:[#allocation2 + $0x38] sm:$0x1e] }
 0x25f   : > { %v1521_v6 = vor.u32 %v1520_v61, %v1517_v60  ;;  %v1540_v7 = vrot.slane %v1538_v62, 5  ;;  %v3115_v8 = vcombine.low %v1416_v50, %v1416_v50  ;;  %v3116_v9 = vcombine.high %v1416_v50, %v1416_v50  ;;  %v1929_v62 = vld [vmem:[#allocation2 + $0x40] sm:$0x1e] }
 0x260   : > { %1587 = vst.msk [vmem:[#allocation3 + $0x38] sm:$0xff] %vm853_vm7, %v3120_v0  ;;  %v1535_v10 = vor.u32 %v1534_v5, %v1531_v4  ;;  %v3117_v53 = vcombine.low %v1417_v58, %v1417_v58  ;;  %v3118_v3 = vcombine.high %v1417_v58, %v1417_v58  ;;  %v3175_v11 = vcombine.low %v1923_v63, %v1923_v63 }
 0x261   : > { %v1522_v12 = vrot.slane %v1521_v6, 4  ;;  %v1543_v2 = vshrl.u32 %v3115_v8, 16  ;;  %v1546_v13 = vshll.u32 %v3115_v8, 16  ;;  %v1552_v15 = vshll.u32 %v3116_v9, 16 }
 0x262   : > { %v1536_v16 = vrot.slane %v1535_v10, 4  ;;  %v1557_v18 = vshrl.u32 %v3117_v53, 16  ;;  %v1560_v19 = vshll.u32 %v3117_v53, 16  ;;  %v1566_v21 = vshll.u32 %v3118_v3, 16 }
 0x263   : > { %v1527_v25 = vsel %vm3982_vm15, %v1522_v12, %v1526_v1  ;;  %v1545_v42 = vrot.slane %v1543_v2, 4  ;;  %v1548_v26 = vrot.slane %v1546_v13, 5  ;;  %v1554_v27 = vrot.slane %v1552_v15, 5 }
 0x264   : > { %v1541_v29 = vsel %vm3982_vm15, %v1536_v16, %v1540_v7  ;;  %v1559_v31 = vrot.slane %v1557_v18, 4  ;;  %v1562_v32 = vrot.slane %v1560_v19, 5  ;;  %v1568_v33 = vrot.slane %v1566_v21, 5 }
 0x265   : > { %v3121_v17 = vcombine.low %v1527_v25, %v1541_v29  ;;  %v1549_v34 = vor.u32 %v1548_v26, %v1545_v42  ;;  %v3176_v35 = vcombine.high %v1923_v63, %v1923_v63  ;;  %v3177_v36 = vcombine.low %v1924_v22, %v1924_v22  ;;  %v3598_v29 = vld [vmem:[%s4446_s4 + $0x110] sm:$0xff]  }
 0x266   : > { %v1563_v38 = vor.u32 %v1562_v32, %v1559_v31  ;;  %v3178_v39 = vcombine.high %v1924_v22, %v1924_v22  ;;  %v3191_v40 = vrot.slane %v3175_v11, 9  ;;  %v3179_v41 = vcombine.low %v1925_v28, %v1925_v28 }
 0x267   : > { %1588 = vst.msk [vmem:[#allocation3 + $0x60] sm:$0xff] %vm853_vm7, %v3121_v17  ;;  %v1550_v23 = vrot.slane %v1549_v34, 4  ;;  %v1973_v24 = vrot.slane %v3176_v35, 5  ;;  %v3192_v43 = vrot.slane %v3177_v36, 9  ;;  %v3180_v44 = vcombine.high %v1925_v28, %v1925_v28 }
 0x268   : > { %v1564_v45 = vrot.slane %v1563_v38, 4  ;;  %v1977_v46 = vrot.slane %v3178_v39, 5  ;;  %v3181_v49 = vcombine.low %v1926_v37, %v1926_v37  ;;  %v3182_v47 = vcombine.high %v1926_v37, %v1926_v37 }
 0x269   : > { %v1555_v50 = vsel %vm3982_vm15, %v1550_v23, %v1554_v27  ;;  %v1974_v51 = vsel %vm3993_vm0, %v3191_v40, %v1973_v24  ;;  %v3193_v52 = vrot.slane %v3179_v41, 9  ;;  %v1981_v56 = vrot.slane %v3180_v44, 5 }
 0x26a   : > { %v1569_v58 = vsel %vm3982_vm15, %v1564_v45, %v1568_v33  ;;  %v1978_v59 = vsel %vm3993_vm0, %v3192_v43, %v1977_v46  ;;  %v3194_v60 = vrot.slane %v3181_v49, 9  ;;  %v1985_v61 = vrot.slane %v3182_v47, 5  ;;  %v3606_v33 = vld [vmem:[%s4446_s4 + $0x118] sm:$0xff]  }
 0x26b   : > { %v3122_v63 = vcombine.low %v1555_v50, %v1569_v58  ;;  %v3199_v0 = vcombine.low %v1974_v51, %v1978_v59  ;;  %v1982_v1 = vsel %vm3993_vm0, %v3193_v52, %v1981_v56  ;;  %v3183_v4 = vcombine.low %v1927_v48, %v1927_v48 }
 0x26c   : > { %v1986_v5 = vsel %vm3993_vm0, %v3194_v60, %v1985_v61  ;;  %v3184_v6 = vcombine.high %v1927_v48, %v1927_v48  ;;  %v3185_v7 = vcombine.low %v1928_v57, %v1928_v57  ;;  %v3186_v8 = vcombine.high %v1928_v57, %v1928_v57  ;;  %v3627_v61 = vld [vmem:[%s4448_s6] sm:$0xff]  }
 0x26d   : > { %1589 = vst.msk [vmem:[#allocation3 + $0x88] sm:$0xff] %vm853_vm7, %v3122_v63  ;;  %2019 = vst.msk [vmem:[#allocation3 + $0x20] sm:$0xff] %vm853_vm7, %v3199_v0  ;;  %v3200_v20 = vcombine.low %v1982_v1, %v1986_v5  ;;  %v3195_v9 = vrot.slane %v3183_v4, 9  ;;  %v3187_v10 = vcombine.low %v1929_v62, %v1929_v62  ;;  %v3188_v53 = vcombine.high %v1929_v62, %v1929_v62  ;;  %v3628_v62 = vld [vmem:[%s4448_s6 + $0x8] sm:$0xff]   ;;  %v3629_v63 = vld [vmem:[%s4448_s6 + $0x10] sm:$0xff]  }
 0x26e   : > { %v1989_v3 = vrot.slane %v3184_v6, 5  ;;  %v3196_v11 = vrot.slane %v3185_v7, 9  ;;  %v1993_v12 = vrot.slane %v3186_v8, 5  ;;  %v2002_v15 = vsel %vm3993_vm0, %v4017_v54, %v4019_v55  ;;  %v3630_v0 = vld [vmem:[%s4448_s6 + $0x18] sm:$0xff]  }
 0x26f   : > { %2020 = vst.msk [vmem:[#allocation3 + $0x48] sm:$0xff] %vm853_vm7, %v3200_v20  ;;  %v3197_v2 = vrot.slane %v3187_v10, 9  ;;  %v1997_v13 = vrot.slane %v3188_v53, 5 }
 0x270   : > { %v1990_v16 = vsel %vm3993_vm0, %v3195_v9, %v1989_v3  ;;  %v1994_v18 = vsel %vm3993_vm0, %v3196_v11, %v1993_v12  ;;  %v4265_v3 = vld [vmem:[%s4447_s5] ss:$0 sm:$0xff] }
 0x271   : > { %v3201_v19 = vcombine.low %v1990_v16, %v1994_v18  ;;  %v1998_v21 = vsel %vm3993_vm0, %v3197_v2, %v1997_v13 }
 0x272   : > { %v3202_v22 = vcombine.low %v1998_v21, %v2002_v15 }
 0x273   : > { %2021 = vst.msk [vmem:[#allocation3 + $0x70] sm:$0xff] %vm853_vm7, %v3201_v19 }
 0x274   : > { %2022 = vst.msk [vmem:[#allocation3 + $0x98] sm:$0xff] %vm853_vm7, %v3202_v22  ;;  %v2027_v51 = vld [vmem:[#allocation3 + $0x20] sm:$0xff] }
 0x276   : > { %v2032_v57 = vld [vmem:[#allocation3 + $0x48] sm:$0xff] }
 0x27a   : > { %v2037_v58 = vld [vmem:[#allocation3 + $0x70] sm:$0xff] }
 0x27b   : > { %v2042_v60 = vld [vmem:[#allocation3 + $0x98] sm:$0xff] }
 0x27f   : > { %v1395_v25 = vpop.permute.xlu0 %1394 }
 0x280   : > { %1406 = vst.msk [vmem:[#allocation3 + $0x8] sm:$0xff] %vm1258_vm1, %v1395_v25 }
 0x287   : > { %v1397_v54 = vpop.permute.xlu1 %1396  ;;  %v2024_v55 = vld [vmem:[#allocation3 + $0x8] sm:$0xff] }
 0x288   : > { %1407 = vst.msk [vmem:[#allocation3 + $0x30] sm:$0xff] %vm1258_vm1, %v1397_v54  ;;  %2382 = vmatprep.mubr.bf16.mxu1 %v2024_v55 }
 0x28a   : > { %v1247_v42 = vpop.permute.xlu0 %1246 }
 0x28b   : > { %1259 = vst.msk [vmem:[#allocation3] sm:$0xff] %vm1258_vm1, %v1247_v42 }
 0x28f   : > { %v2029_v27 = vld [vmem:[#allocation3 + $0x30] sm:$0xff] }
 0x292   : > { %v2023_v26 = vld [vmem:[#allocation3] sm:$0xff] }
 0x293   : > { %2383 = vmatmul.mubr.bf16.vlgmr.msra.gmra.mrb[16].mxu1 %v2023_v26 }
 0x294   : > { %v1908_v28 = vpop.permute.xlu0 %1907  ;;  %3371 = vmatpush3.bf16.msra.mxu1 %v4062_v14  ;;  %2390 = vmatprep.mubr.bf16.mxu1 %v2029_v27 }
 0x295   : > { %1919 = vst.msk [vmem:[#allocation3 + $0x18] sm:$0xff] %vm1258_vm1, %v1908_v28  ;;  %3372 = vmatprep.subr.bf16.mxu1 %v3587_v30 }
 0x298   : > { %v1399_v31 = vpop.permute.xlu0 %1398  ;;  %3373 = vmatpush3.bf16.msra.mxu1 %v3587_v30 }
 0x299   : > { %v1249_v32 = vpop.permute.xlu1 %1248  ;;  %1408 = vst.msk [vmem:[#allocation3 + $0x58] sm:$0xff] %vm1258_vm1, %v1399_v31  ;;  %3374 = vmatprep.subr.bf16.mxu1 %v3598_v29 }
 0x29a   : > { %1260 = vst.msk [vmem:[#allocation3 + $0x28] sm:$0xff] %vm1258_vm1, %v1249_v32 }
 0x29c   : > { %v2026_v14 = vld [vmem:[#allocation3 + $0x18] sm:$0xff]  ;;  %3375 = vmatpush3.bf16.msra.mxu1 %v3598_v29 }
 0x29d   : > { %v1683_v17 = vpop.permute.xlu1 %1682  ;;  %2447 = vmatprep.mubr.bf16.mxu0 %v2026_v14  ;;  %3376 = vmatprep.subr.bf16.mxu1 %v3606_v33 }
 0x29e   : > { %1694 = vst.msk [vmem:[#allocation3 + $0x10] sm:$0xff] %vm1258_vm1, %v1683_v17 }
 0x2a0   : > { %v2034_v34 = vld [vmem:[#allocation3 + $0x58] sm:$0xff]  ;;  %3377 = vmatpush3.bf16.msra.mxu1 %v3606_v33 }
 0x2a1   : > { %v2028_v35 = vld [vmem:[#allocation3 + $0x28] sm:$0xff]  ;;  %3386 = vmatprep.subr.bf16.mxu1 %v3627_v61 }
 0x2a2   : > { %2391 = vmatmul.mubr.bf16.gmra.mrb[20].mxu1 %v2028_v35 }
 0x2a3   : > { %v1910_v36 = vpop.permute.xlu0 %1909  ;;  %2398 = vmatprep.mubr.bf16.mxu1 %v2034_v34 }
 0x2a4   : > { %1920 = vst.msk [vmem:[#allocation3 + $0x40] sm:$0xff] %vm1258_vm1, %v1910_v36 }
 0x2a5   : > { %v2025_v37 = vld [vmem:[#allocation3 + $0x10] sm:$0xff] }
 0x2a6   : > { %2448 = vmatmul.mubr.bf16.vlgmr.msra.gmra.mrb[16].mxu0 %v2025_v37 }
 0x2a7   : > { %v1251_v38 = vpop.permute.xlu1 %1250  ;;  %v1401_v39 = vpop.permute.xlu0 %1400 }
 0x2a8   : > { %1261 = vst.msk [vmem:[#allocation3 + $0x50] sm:$0xff] %vm1258_vm1, %v1251_v38  ;;  %1409 = vst.msk [vmem:[#allocation3 + $0x80] sm:$0xff] %vm1258_vm1, %v1401_v39 }
 0x2ab   : > { %v1685_v40 = vpop.permute.xlu1 %1684  ;;  %v2031_v41 = vld [vmem:[#allocation3 + $0x40] sm:$0xff] }
 0x2ac   : > { %1695 = vst.msk [vmem:[#allocation3 + $0x38] sm:$0xff] %vm1258_vm1, %v1685_v40  ;;  %2455 = vmatprep.mubr.bf16.mxu0 %v2031_v41 }
 0x2af   : > { %v2033_v23 = vld [vmem:[#allocation3 + $0x50] sm:$0xff]  ;;  %v2039_v24 = vld [vmem:[#allocation3 + $0x80] sm:$0xff] }
 0x2b0   : > { %2399 = vmatmul.mubr.bf16.gmra.mrb[24].mxu1 %v2033_v23 }
 0x2b1   : > { %v1912_v43 = vpop.permute.xlu0 %1911  ;;  %2406 = vmatprep.mubr.bf16.mxu1 %v2039_v24 }
 0x2b2   : > { %1921 = vst.msk [vmem:[#allocation3 + $0x68] sm:$0xff] %vm1258_vm1, %v1912_v43 }
 0x2b3   : > { %v2030_v44 = vld [vmem:[#allocation3 + $0x38] sm:$0xff] }
 0x2b4   : > { %2456 = vmatmul.mubr.bf16.gmra.mrb[20].mxu0 %v2030_v44 }
 0x2b5   : > { %v1253_v45 = vpop.permute.xlu1 %1252 }
 0x2b6   : > { %1262 = vst.msk [vmem:[#allocation3 + $0x78] sm:$0xff] %vm1258_vm1, %v1253_v45 }
 0x2b9   : > { %v1687_v46 = vpop.permute.xlu1 %1686  ;;  %v2036_v49 = vld [vmem:[#allocation3 + $0x68] sm:$0xff] }
 0x2ba   : > { %v1914_v47 = vpop.permute.xlu0 %1913  ;;  %1696 = vst.msk [vmem:[#allocation3 + $0x60] sm:$0xff] %vm1258_vm1, %v1687_v46  ;;  %2463 = vmatprep.mubr.bf16.mxu0 %v2036_v49 }
 0x2bb   : > { %1922 = vst.msk [vmem:[#allocation3 + $0x90] sm:$0xff] %vm1258_vm1, %v1914_v47 }
 0x2bd   : > { %v1689_v48 = vpop.permute.xlu1 %1688  ;;  %v2038_v50 = vld [vmem:[#allocation3 + $0x78] sm:$0xff] }
 0x2be   : > { %1697 = vst.msk [vmem:[#allocation3 + $0x88] sm:$0xff] %vm1258_vm1, %v1689_v48  ;;  %2407 = vmatmul.mubr.bf16.gmra.mrb[28].mxu1 %v2038_v50 }
 0x2bf   : > { %3378 = vmatprep.mubr.msk.bf16.mxu1 %vm853_vm7, %v2027_v51 }
 0x2c1   : > { %v2035_v52 = vld [vmem:[#allocation3 + $0x60] sm:$0xff] }
 0x2c2   : > { %2464 = vmatmul.mubr.bf16.gmra.mrb[24].mxu0 %v2035_v52  ;;  %v2041_v56 = vld [vmem:[#allocation3 + $0x90] sm:$0xff] }
 0x2c3   : > { %2471 = vmatprep.mubr.bf16.mxu0 %v2041_v56 }
 0x2c5   : > { %v2040_v59 = vld [vmem:[#allocation3 + $0x88] sm:$0xff] }
 0x2c6   : > { %3379 = vmatmul.mubr.msk.bf16.vlgmr.msra.gmra.mrb[32].mxu1 %vm853_vm7, %v2032_v57 }
 0x2c7   : > { %3382 = vmatprep.mubr.msk.bf16.mxu1 %vm853_vm7, %v2037_v58  ;;  %3387 = vmatpush3.bf16.msra.mxu1 %v3627_v61 }
 0x2c8   : > { %3388 = vmatprep.subr.bf16.mxu1 %v3628_v62 }
 0x2ca   : > { %2472 = vmatmul.mubr.bf16.gmra.mrb[28].mxu0 %v2040_v59 }
 0x2cb   : > { %3389 = vmatpush3.bf16.msra.mxu1 %v3628_v62 }
 0x2cc   : > { %3390 = vmatprep.subr.bf16.mxu1 %v3629_v63 }
 0x2ce   : > { %3383 = vmatmul.mubr.msk.bf16.gmra.mrb[36].mxu1 %vm853_vm7, %v2042_v60 }
 0x2cf   : > { %3391 = vmatpush3.bf16.msra.mxu1 %v3629_v63 }
 0x2d0   : > { %3392 = vmatprep.subr.bf16.mxu1 %v3630_v0 }
 0x2d3   : > { %3393 = vmatpush3.bf16.msra.mxu1 %v3630_v0 }
 0x366   : > { %v3290_v1 = vpop.f32.mrb[16].mxu1 }
 0x367   : > { %v3291_v4 = vpop.f32.mrb[17].mxu1 }
 0x368   : > { %v3292_v5 = vadd.f32 %v3291_v4, %v3290_v1  ;;  %v3293_v6 = vpop.f32.mrb[18].mxu1 }
 0x369   : > { %v3294_v7 = vpop.f32.mrb[19].mxu1 }
 0x36a   : > { %v3295_v8 = vadd.f32 %v3294_v7, %v3293_v6  ;;  %v2385_v15 = vadd.f32 %v3292_v5, %v4265_v3 }
 0x36c   : > { %v2388_v21 = vadd.f32 %v3295_v8, %v4265_v3 }
 0x375   : > { %v3296_v20 = vpop.f32.mrb[20].mxu1 }
 0x376   : > { %v3297_v9 = vpop.f32.mrb[21].mxu1 }
 0x377   : > { %v3298_v10 = vadd.f32 %v3297_v9, %v3296_v20  ;;  %v3299_v53 = vpop.f32.mrb[22].mxu1 }
 0x378   : > { %v3300_v11 = vpop.f32.mrb[23].mxu1 }
 0x379   : > { %v3301_v12 = vadd.f32 %v3300_v11, %v3299_v53  ;;  %v3330_v2 = vpop.f32.mrb[16].mxu0  ;;  %v2393_v32 = vadd.f32 %v3298_v10, %v4265_v3 }
 0x37a   : > { %v3331_v13 = vpop.f32.mrb[17].mxu0 }
 0x37b   : > { %v3332_v16 = vadd.f32 %v3331_v13, %v3330_v2  ;;  %v3333_v18 = vpop.f32.mrb[18].mxu0  ;;  %v2396_v34 = vadd.f32 %v3301_v12, %v4265_v3 }
 0x37c   : > { %v3334_v19 = vpop.f32.mrb[19].mxu0 }
 0x37d   : > { %v3335_v22 = vadd.f32 %v3334_v19, %v3333_v18  ;;  %v2450_v25 = vadd.f32 %v3332_v16, %v2385_v15 }
 0x37f   : > { %v2453_v54 = vadd.f32 %v3335_v22, %v2388_v21 }
 0x383   : > { %v3302_v55 = vpop.f32.mrb[24].mxu1 }
 0x384   : > { %v3303_v42 = vpop.f32.mrb[25].mxu1 }
 0x385   : > { %v3304_v30 = vadd.f32 %v3303_v42, %v3302_v55  ;;  %v3305_v26 = vpop.f32.mrb[26].mxu1 }
 0x386   : > { %v3306_v27 = vpop.f32.mrb[27].mxu1 }
 0x387   : > { %v3307_v28 = vadd.f32 %v3306_v27, %v3305_v26  ;;  %v3336_v29 = vpop.f32.mrb[20].mxu0  ;;  %v2401_v45 = vadd.f32 %v3304_v30, %v4265_v3 }
 0x388   : > { %v3337_v31 = vpop.f32.mrb[21].mxu0 }
 0x389   : > { %v3338_v33 = vadd.f32 %v3337_v31, %v3336_v29  ;;  %v3339_v14 = vpop.f32.mrb[22].mxu0  ;;  %v2404_v48 = vadd.f32 %v3307_v28, %v4265_v3  ;;  %v3641_v29 = vmov -inf   ;;  %v3244_v31 = vld [vmem:[%s4449_s7] ss:$0 sm:$0xff] }
 0x38a   : > { %v3340_v17 = vpop.f32.mrb[23].mxu0  ;;  %2691 = vst.msk [vmem:[#allocation4 + $0x30] sm:$0x1] %vm2687_vm3, %v3641_v29  ;;  %2701 = vst.msk [vmem:[#allocation4 + $0x39] sm:$0x1] %vm2687_vm3, %v3641_v29 }
 0x38b   : > { %v3341_v35 = vadd.f32 %v3340_v17, %v3339_v14  ;;  %v2458_v36 = vadd.f32 %v3338_v33, %v2393_v32  ;;  %2682 = vst.msk [vmem:[#allocation4] sm:$0xff] %vm2673_vm2, %v3641_v29  ;;  %2683 = vst.msk [vmem:[#allocation4 + $0x8] sm:$0xff] %vm2673_vm2, %v3641_v29 }
 0x38c   : > { %2685 = vst.msk [vmem:[#allocation4 + $0x90] sm:$0xff] %vm2673_vm2, %v3641_v29  ;;  %2686 = vst.msk [vmem:[#allocation4 + $0x98] sm:$0xff] %vm2673_vm2, %v3641_v29 }
 0x38d   : > { %v2461_v37 = vadd.f32 %v3341_v35, %v2396_v34  ;;  %2689 = vst.msk [vmem:[#allocation4 + $0x10] sm:$0x1] %vm2687_vm3, %v3641_v29  ;;  %2690 = vst.msk [vmem:[#allocation4 + $0x20] sm:$0x1] %vm2687_vm3, %v3641_v29 }
 0x38e   : > { %2692 = vst.msk [vmem:[#allocation4 + $0x40] sm:$0x1] %vm2687_vm3, %v3641_v29  ;;  %2693 = vst.msk [vmem:[#allocation4 + $0x50] sm:$0x1] %vm2687_vm3, %v3641_v29 }
 0x38f   : > { %2694 = vst.msk [vmem:[#allocation4 + $0x60] sm:$0x1] %vm2687_vm3, %v3641_v29  ;;  %2695 = vst.msk [vmem:[#allocation4 + $0x70] sm:$0x1] %vm2687_vm3, %v3641_v29 }
 0x390   : > { %2696 = vst.msk [vmem:[#allocation4 + $0x80] sm:$0x1] %vm2687_vm3, %v3641_v29  ;;  %2699 = vst.msk [vmem:[#allocation4 + $0x19] sm:$0x1] %vm2687_vm3, %v3641_v29 }
 0x391   : > { %v3308_v38 = vpop.f32.mrb[28].mxu1  ;;  %2700 = vst.msk [vmem:[#allocation4 + $0x29] sm:$0x1] %vm2687_vm3, %v3641_v29  ;;  %2702 = vst.msk [vmem:[#allocation4 + $0x49] sm:$0x1] %vm2687_vm3, %v3641_v29 }
 0x392   : > { %v3309_v39 = vpop.f32.mrb[29].mxu1  ;;  %2703 = vst.msk [vmem:[#allocation4 + $0x59] sm:$0x1] %vm2687_vm3, %v3641_v29  ;;  %2704 = vst.msk [vmem:[#allocation4 + $0x69] sm:$0x1] %vm2687_vm3, %v3641_v29 }
 0x393   : > { %v3310_v40 = vadd.f32 %v3309_v39, %v3308_v38  ;;  %v3311_v41 = vpop.f32.mrb[30].mxu1  ;;  %2705 = vst.msk [vmem:[#allocation4 + $0x79] sm:$0x1] %vm2687_vm3, %v3641_v29  ;;  %2706 = vst.msk [vmem:[#allocation4 + $0x89] sm:$0x1] %vm2687_vm3, %v3641_v29 }
 0x394   : > { %v3312_v23 = vpop.f32.mrb[31].mxu1  ;;  %2688 = vst.msk [vmem:[#allocation4] sm:$0x1] %vm2687_vm3, %v3641_v29  ;;  %2698 = vst.msk [vmem:[#allocation4 + $0x9] sm:$0x1] %vm2687_vm3, %v3641_v29 }
 0x395   : > { %v3313_v24 = vadd.f32 %v3312_v23, %v3311_v41  ;;  %v3342_v43 = vpop.f32.mrb[24].mxu0  ;;  %v2409_v6 = vadd.f32 %v3310_v40, %v4265_v3  ;;  %2697 = vst.msk [vmem:[#allocation4 + $0x90] sm:$0x1] %vm2687_vm3, %v3641_v29  ;;  %2707 = vst.msk [vmem:[#allocation4 + $0x99] sm:$0x1] %vm2687_vm3, %v3641_v29 }
 0x396   : > { %v3343_v44 = vpop.f32.mrb[25].mxu0 }
 0x397   : > { %v3344_v46 = vadd.f32 %v3343_v44, %v3342_v43  ;;  %v3345_v49 = vpop.f32.mrb[26].mxu0  ;;  %v2412_v11 = vadd.f32 %v3313_v24, %v4265_v3 }
 0x398   : > { %v3346_v47 = vpop.f32.mrb[27].mxu0 }
 0x399   : > { %v3347_v50 = vadd.f32 %v3346_v47, %v3345_v49  ;;  %v3380_v51 = vpop.f32.mrb[32].mxu1  ;;  %v2466_v52 = vadd.f32 %v3344_v46, %v2401_v45 }
 0x39a   : > { %v2523_v56 = vadd.f32 %v3380_v51, %v2458_v36  ;;  %v2514_v57 = vpop.f32.mrb[33].mxu1  ;;  %v2733_v36 = vld [vmem:[#allocation4 + $0x1] sm:$0xff] }
 0x39b   : > { %v2515_v58 = vadd.f32 %v2514_v57, %v2450_v25  ;;  %v3381_v59 = vpop.f32.mrb[34].mxu1  ;;  %v2469_v60 = vadd.f32 %v3347_v50, %v2404_v48  ;;  %v2717_v17 = vld [vmem:[#allocation4] sm:$0xff] }
 0x39c   : > { %v2526_v61 = vadd.f32 %v3381_v59, %v2461_v37  ;;  %v2517_v62 = vpop.f32.mrb[35].mxu1  ;;  %v2547_v1 = vmax.f32 %v2523_v56, 0.0  ;;  %v2749_v23 = vld [vmem:[#allocation4 + $0x2] sm:$0xff] }
 0x39d   : > { %v2518_v63 = vadd.f32 %v2517_v62, %v2453_v54  ;;  %v3348_v0 = vpop.f32.mrb[28].mxu0  ;;  %v2545_v7 = vmax.f32 %v2515_v58, 0.0 }
 0x39e   : > { %v2548_v4 = vmax.f32 %v2526_v61, 0.0  ;;  %v3349_v5 = vpop.f32.mrb[29].mxu0 }
 0x39f   : > { %v2546_v8 = vmax.f32 %v2518_v63, 0.0  ;;  %v3350_v20 = vadd.f32 %v3349_v5, %v3348_v0  ;;  %v3351_v9 = vpop.f32.mrb[30].mxu0 }
 0x3a0   : > { %v2554_v10 = vpack.c.bf16 %v2548_v4, %v2547_v1  ;;  %v3352_v53 = vpop.f32.mrb[31].mxu0 }
 0x3a1   : > { %v2553_v12 = vpack.c.bf16 %v2546_v8, %v2545_v7  ;;  %v3353_v2 = vadd.f32 %v3352_v53, %v3351_v9  ;;  %v2474_v13 = vadd.f32 %v3350_v20, %v2409_v6  ;;  %v3384_v15 = vpop.f32.mrb[36].mxu1 }
 0x3a2   : > { %v2530_v16 = vpop.f32.mrb[37].mxu1 }
 0x3a3   : > { %v2539_v18 = vadd.f32 %v3384_v15, %v2474_v13  ;;  %v2531_v19 = vadd.f32 %v2530_v16, %v2466_v52  ;;  %v2477_v21 = vadd.f32 %v3353_v2, %v2412_v11  ;;  %v3385_v22 = vpop.f32.mrb[38].mxu1  ;;  %3394 = vmatprep.mubr.msk.bf16.mxu1 %vm853_vm7, %v2553_v12 }
 0x3a4   : > { %v2533_v25 = vpop.f32.mrb[39].mxu1  ;;  %3395 = vmatmul.mubr.msk.bf16.vlgmr.msra.gmra.mrb[40].mxu1 %vm853_vm7, %v2554_v10 }
 0x3a5   : > { %v2542_v54 = vadd.f32 %v3385_v22, %v2477_v21  ;;  %v2534_v55 = vadd.f32 %v2533_v25, %v2469_v60  ;;  %v2551_v42 = vmax.f32 %v2539_v18, 0.0  ;;  %v2549_v30 = vmax.f32 %v2531_v19, 0.0 }
 0x3a7   : > { %v2552_v26 = vmax.f32 %v2542_v54, 0.0  ;;  %v2550_v3 = vmax.f32 %v2534_v55, 0.0 }
 0x3a9   : > { %v2556_v27 = vpack.c.bf16 %v2552_v26, %v2551_v42  ;;  %v2555_v28 = vpack.c.bf16 %v2550_v3, %v2549_v30 }
 0x3ab   : > { %3398 = vmatprep.mubr.msk.bf16.mxu1 %vm853_vm7, %v2555_v28 }
 0x3ac   : > { %3399 = vmatmul.mubr.msk.bf16.gmra.mrb[44].mxu1 %vm853_vm7, %v2556_v27 }
 0x477   : > { %v3396_v32 = vpop.f32.mrb[40].mxu1 }
 0x478   : > { %v4312_v33 = vadd.f32 %v3396_v32, %v3244_v31  ;;  %v2642_v14 = vpop.f32.mrb[41].mxu1 }
 0x479   : > { %v4314_v34 = vadd.f32 %v3244_v31, %v2642_v14  ;;  %v3397_v35 = vpop.f32.mrb[42].mxu1 }
 0x47a   : > { %2676 = vst.msk [vmem:[%s4310_s17 + $0x10] sm:$0xff] %vm2673_vm2, %v4312_v33  ;;  %2711 = vst.msk [vmem:[#allocation4 + $0x31] sm:$0xff] %vm2673_vm2, %v4312_v33  ;;  %v4321_v37 = vadd.f32 %v3397_v35, %v3244_v31  ;;  %v2645_v38 = vpop.f32.mrb[43].mxu1 }
 0x47b   : > { %2674 = vst.msk [vmem:[%s4310_s17] sm:$0xff] %vm2673_vm2, %v4314_v34  ;;  %2709 = vst.msk [vmem:[#allocation4 + $0x11] sm:$0xff] %vm2673_vm2, %v4314_v34  ;;  %v2725_v39 = vmax.f32 %v4314_v34, %v2717_v17  ;;  %v4329_v40 = vadd.f32 %v3244_v31, %v2645_v38 }
 0x47c   : > { %2677 = vst.msk [vmem:[%s4310_s17 + $0x18] sm:$0xff] %vm2673_vm2, %v4321_v37  ;;  %2712 = vst.msk [vmem:[#allocation4 + $0x41] sm:$0xff] %vm2673_vm2, %v4321_v37 }
 0x47d   : > { %v2741_v41 = vmax.f32 %v2725_v39, %v2733_v36  ;;  %2675 = vst.msk [vmem:[%s4310_s17 + $0x8] sm:$0xff] %vm2673_vm2, %v4329_v40  ;;  %2710 = vst.msk [vmem:[#allocation4 + $0x21] sm:$0xff] %vm2673_vm2, %v4329_v40 }
 0x47f   : > { %v3400_v24 = vpop.f32.mrb[44].mxu1  ;;  %v2757_v46 = vmax.f32 %v2741_v41, %v2749_v23  ;;  %v3642_v41 = vmov 0.0  }
 0x480   : > { %v4341_v43 = vadd.f32 %v3400_v24, %v3244_v31  ;;  %v2658_v44 = vpop.f32.mrb[45].mxu1 }
 0x481   : > { %v2767_v45 = vld [vmem:[#allocation4 + $0x30] sm:$0xff]  ;;  %v4343_v49 = vadd.f32 %v3244_v31, %v2658_v44  ;;  %v3401_v47 = vpop.f32.mrb[46].mxu1 }
 0x482   : > { %v2765_v48 = vld [vmem:[#allocation4 + $0x10] sm:$0xff]  ;;  %v2728_v50 = vmax.f32 %v4321_v37, %v2767_v45  ;;  %2680 = vst.msk [vmem:[%s4310_s17 + $0x30] sm:$0xff] %vm2673_vm2, %v4341_v43  ;;  %2715 = vst.msk [vmem:[#allocation4 + $0x71] sm:$0xff] %vm2673_vm2, %v4341_v43  ;;  %v4351_v51 = vadd.f32 %v3401_v47, %v3244_v31  ;;  %v2661_v52 = vpop.f32.mrb[47].mxu1 }
 0x483   : > { %v2773_v56 = vmax.f32 %v2757_v46, %v2765_v48  ;;  %v4353_v57 = vld [vmem:[#allocation4 + $0x31] sm:$0xff]  ;;  %v2768_v58 = vld [vmem:[#allocation4 + $0x40] sm:$0xff]  ;;  %v2726_v59 = vmax.f32 %v4329_v40, %v2765_v48  ;;  %2678 = vst.msk [vmem:[%s4310_s17 + $0x20] sm:$0xff] %vm2673_vm2, %v4343_v49  ;;  %2713 = vst.msk [vmem:[#allocation4 + $0x51] sm:$0xff] %vm2673_vm2, %v4343_v49  ;;  %v4361_v60 = vadd.f32 %v3244_v31, %v2661_v52 }
 0x484   : > { %v2781_v61 = vld [vmem:[#allocation4 + $0x12] sm:$0xff]  ;;  %v2744_v62 = vmax.f32 %v2728_v50, %v4353_v57  ;;  %v2719_v63 = vld [vmem:[#allocation4 + $0x20] sm:$0xff]  ;;  %v2729_v1 = vmax.f32 %v4343_v49, %v2768_v58  ;;  %2681 = vst.msk [vmem:[%s4310_s17 + $0x38] sm:$0xff] %vm2673_vm2, %v4351_v51  ;;  %2716 = vst.msk [vmem:[#allocation4 + $0x81] sm:$0xff] %vm2673_vm2, %v4351_v51 }
 0x485   : > { %v2734_v0 = vld [vmem:[#allocation4 + $0x11] sm:$0xff]  ;;  %v2789_v5 = vmax.f32 %v2773_v56, %v2781_v61  ;;  %v4370_v6 = vld [vmem:[#allocation4 + $0x41] sm:$0xff]  ;;  %v2727_v7 = vmax.f32 %v4312_v33, %v2719_v63  ;;  %2679 = vst.msk [vmem:[%s4310_s17 + $0x28] sm:$0xff] %vm2673_vm2, %v4361_v60  ;;  %2714 = vst.msk [vmem:[#allocation4 + $0x61] sm:$0xff] %vm2673_vm2, %v4361_v60 }
 0x486   : > { %v2783_v4 = vld [vmem:[#allocation4 + $0x32] sm:$0xff]  ;;  %v2742_v8 = vmax.f32 %v2726_v59, %v2734_v0  ;;  %v2735_v9 = vld [vmem:[#allocation4 + $0x21] sm:$0xff]  ;;  %v2745_v10 = vmax.f32 %v2729_v1, %v4370_v6 }
 0x487   : > { %v2760_v20 = vmax.f32 %v2744_v62, %v2783_v4  ;;  %v2784_v53 = vld [vmem:[#allocation4 + $0x42] sm:$0xff]  ;;  %v2743_v11 = vmax.f32 %v2727_v7, %v2735_v9  ;;  %v2806_v2 = vmax.f32 %v2789_v5, %v2719_v63  ;;  %v2805_v7 = vld [vmem:[#allocation4 + $0x90] sm:$0xff] }
 0x488   : > { %v2758_v12 = vmax.f32 %v2742_v8, %v2781_v61  ;;  %v2751_v15 = vld [vmem:[#allocation4 + $0x22] sm:$0xff]  ;;  %v2761_v16 = vmax.f32 %v2745_v10, %v2784_v53 }
 0x489   : > { %v2776_v13 = vmax.f32 %v2760_v20, %v2768_v58  ;;  %v2759_v18 = vmax.f32 %v2743_v11, %v2751_v15  ;;  %v2822_v21 = vmax.f32 %v2806_v2, %v2735_v9  ;;  %v4379_v22 = vld [vmem:[#allocation4 + $0x70] sm:$0xff] }
 0x48a   : > { %v2774_v19 = vmax.f32 %v2758_v12, %v2719_v63  ;;  %v2769_v54 = vld [vmem:[#allocation4 + $0x50] sm:$0xff]  ;;  %v2732_v55 = vmax.f32 %v4351_v51, %v4379_v22 }
 0x48b   : > { %v2792_v25 = vmax.f32 %v2776_v13, %v2784_v53  ;;  %v2775_v42 = vmax.f32 %v2759_v18, %v2767_v45  ;;  %v2838_v26 = vmax.f32 %v2822_v21, %v2751_v15  ;;  %v2777_v3 = vmax.f32 %v2761_v16, %v2769_v54  ;;  %v4383_v27 = vld [vmem:[#allocation4 + $0x71] sm:$0xff]  ;;  %v2772_v50 = vld [vmem:[#allocation4 + $0x80] sm:$0xff] }
 0x48c   : > { %v2790_v30 = vmax.f32 %v2774_v19, %v2751_v15  ;;  %v2785_v28 = vld [vmem:[#allocation4 + $0x52] sm:$0xff]  ;;  %v2748_v31 = vmax.f32 %v2732_v55, %v4383_v27  ;;  %v2723_v32 = vld [vmem:[#allocation4 + $0x60] sm:$0xff]  ;;  %v2730_v14 = vmax.f32 %v4361_v60, %v2769_v54 }
 0x48d   : > { %v2809_v29 = vmax.f32 %v2792_v25, %v2769_v54  ;;  %v2791_v17 = vmax.f32 %v2775_v42, %v2783_v4  ;;  %vm2846_vm4 = vcmp.eq.f32.partialorder %v2838_v26, %v4314_v34  ;;  %v2787_v36 = vld [vmem:[#allocation4 + $0x72] sm:$0xff]  ;;  %v2793_v38 = vmax.f32 %v2777_v3, %v2785_v28  ;;  %v2739_v52 = vld [vmem:[#allocation4 + $0x61] sm:$0xff] }
 0x48e   : > { %v2807_v35 = vmax.f32 %v2790_v30, %v2767_v45  ;;  %v2817_v39 = vld [vmem:[#allocation4 + $0x51] sm:$0xff]  ;;  %v3253_v23 = vsel %vm2846_vm4, 1.0, %v3642_v41  ;;  %v2764_v44 = vmax.f32 %v2748_v31, %v2787_v36  ;;  %v2731_v46 = vmax.f32 %v4341_v43, %v2723_v32  ;;  %v2788_v5 = vld [vmem:[#allocation4 + $0x82] sm:$0xff] }
 0x48f   : > { %v2825_v24 = vmax.f32 %v2809_v29, %v2817_v39  ;;  %v2808_v47 = vmax.f32 %v2791_v17, %v2768_v58  ;;  %v2870_v48 = vmul.f32 %v3253_v23, %v4314_v34  ;;  %v2746_v56 = vmax.f32 %v2730_v14, %v2817_v39  ;;  %v2755_v8 = vld [vmem:[#allocation4 + $0x62] sm:$0xff]  ;;  %v2821_v11 = vld [vmem:[#allocation4 + $0x91] sm:$0xff] }
 0x490   : > { %v2823_v45 = vmax.f32 %v2807_v35, %v4353_v57  ;;  %v2780_v61 = vmax.f32 %v2764_v44, %v2772_v50  ;;  %v2747_v62 = vmax.f32 %v2731_v46, %v2739_v52  ;;  %v2810_v63 = vmax.f32 %v2793_v38, %v2723_v32  ;;  %v2820_v30 = vld [vmem:[#allocation4 + $0x81] sm:$0xff] }
 0x491   : > { %v2841_v59 = vmax.f32 %v2825_v24, %v2785_v28  ;;  %v2824_v0 = vmax.f32 %v2808_v47, %v4370_v6  ;;  %2878 = vst.msk [vmem:[%s4392_s21] sm:$0xff] %vm2673_vm2, %v2870_v48  ;;  %v2762_v58 = vmax.f32 %v2746_v56, %v2785_v28 }
 0x492   : > { %v2839_v1 = vmax.f32 %v2823_v45, %v2783_v4  ;;  %v2796_v57 = vmax.f32 %v2780_v61, %v2788_v5  ;;  %v2763_v34 = vmax.f32 %v2747_v62, %v2755_v8  ;;  %v2826_v20 = vmax.f32 %v2810_v63, %v2739_v52 }
 0x493   : > { %vm2849_vm5 = vcmp.eq.f32.partialorder %v2841_v59, %v4321_v37  ;;  %v2840_v9 = vmax.f32 %v2824_v0, %v2784_v53  ;;  %v2778_v4 = vmax.f32 %v2762_v58, %v2723_v32  ;;  %v2837_v53 = vld [vmem:[#allocation4 + $0x92] sm:$0xff] }
 0x494   : > { %vm2847_vm6 = vcmp.eq.f32.partialorder %v2839_v1, %v4329_v40  ;;  %v3256_v10 = vsel %vm2849_vm5, 1.0, %v3642_v41  ;;  %v2813_v2 = vmax.f32 %v2796_v57, %v2805_v7  ;;  %v2779_v13 = vmax.f32 %v2763_v34, %v4379_v22 }
 0x495   : > { %v3254_v6 = vsel %vm2847_vm6, 1.0, %v3642_v41  ;;  %v2873_v12 = vmul.f32 %v3256_v10, %v4321_v37  ;;  %vm2848_vm7 = vcmp.eq.f32.partialorder %v2840_v9, %v4312_v33  ;;  %v2794_v16 = vmax.f32 %v2778_v4, %v2755_v8 }
 0x496   : > { %v2871_v15 = vmul.f32 %v3254_v6, %v4329_v40  ;;  %v2842_v18 = vmax.f32 %v2826_v20, %v2755_v8  ;;  %v3255_v19 = vsel %vm2848_vm7, 1.0, %v3642_v41  ;;  %v2829_v21 = vmax.f32 %v2813_v2, %v2821_v11 }
 0x497   : > { %2881 = vst.msk [vmem:[%s4392_s21 + $0x18] sm:$0xff] %vm2673_vm2, %v2873_v12  ;;  %v2795_v25 = vmax.f32 %v2779_v13, %v2787_v36  ;;  %v2872_v37 = vmul.f32 %v3255_v19, %v4312_v33  ;;  %v2811_v54 = vmax.f32 %v2794_v16, %v4379_v22 }
 0x498   : > { %2879 = vst.msk [vmem:[%s4392_s21 + $0x8] sm:$0xff] %vm2673_vm2, %v2871_v15  ;;  %vm2850_vm8 = vcmp.eq.f32.partialorder %v2842_v18, %v4343_v49  ;;  %v2845_v40 = vmax.f32 %v2829_v21, %v2837_v53 }
 0x499   : > { %v2812_v55 = vmax.f32 %v2795_v25, %v2772_v50  ;;  %v3257_v42 = vsel %vm2850_vm8, 1.0, %v3642_v41  ;;  %2880 = vst.msk [vmem:[%s4392_s21 + $0x10] sm:$0xff] %vm2673_vm2, %v2872_v37  ;;  %v2827_v26 = vmax.f32 %v2811_v54, %v4383_v27 }
 0x49a   : > { %v2874_v3 = vmul.f32 %v3257_v42, %v4343_v49  ;;  %vm2853_vm9 = vcmp.eq.f32.partialorder %v2845_v40, %v4351_v51 }
 0x49b   : > { %v2828_v33 = vmax.f32 %v2812_v55, %v2820_v30  ;;  %v3260_v22 = vsel %vm2853_vm9, 1.0, %v3642_v41  ;;  %v2843_v28 = vmax.f32 %v2827_v26, %v2787_v36 }
 0x49c   : > { %2882 = vst.msk [vmem:[%s4392_s21 + $0x20] sm:$0xff] %vm2673_vm2, %v2874_v3  ;;  %v2877_v29 = vmul.f32 %v3260_v22, %v4351_v51 }
 0x49d   : > { %v2844_v31 = vmax.f32 %v2828_v33, %v2788_v5  ;;  %vm2851_vm10 = vcmp.eq.f32.partialorder %v2843_v28, %v4361_v60 }
 0x49e   : > { %2885 = vst.msk [vmem:[%s4392_s21 + $0x38] sm:$0xff] %vm2673_vm2, %v2877_v29  ;;  %v3258_v49 = vsel %vm2851_vm10, 1.0, %v3642_v41 }
 0x49f   : > { %vm2852_vm11 = vcmp.eq.f32.partialorder %v2844_v31, %v4341_v43  ;;  %v2875_v32 = vmul.f32 %v3258_v49, %v4361_v60 }
 0x4a0   : > { %v3259_v27 = vsel %vm2852_vm11, 1.0, %v3642_v41 }
 0x4a1   : > { %v2876_v14 = vmul.f32 %v3259_v27, %v4341_v43  ;;  %2883 = vst.msk [vmem:[%s4392_s21 + $0x28] sm:$0xff] %vm2673_vm2, %v2875_v32 }
 0x4a3   : > { %2884 = vst.msk [vmem:[%s4392_s21 + $0x30] sm:$0xff] %vm2673_vm2, %v2876_v14 }
 0x4a4 PF: > { %s20_s30 = sadd.s32 1, %s3637_s30  }
 0x4a5   : > { %p17_p4 = scmp.ge.s32.totalorder %s20_s30, 4  }
 0x4a7   :  { %19 = sbr.rel (!%p17_p4) target bundleno = 1 (0x1), region = 100 }

</bundles_post_ra>
